<compile_context>
chip_gen: v5e
topology: v5e:2x2
jax: 0.10.0
libtpu: 0.0.40
codegen_flags: <defaults>
</compile_context>

<pallas_src>
import math
import jax
import jax.numpy as jnp
from jax.experimental import pallas as pl
from jax.experimental.pallas import tpu as pltpu

# ---- model dims (small, consistent with the module) -------------------------
B = 2          # batch
S = 8          # target sequence length
S_SRC = 8      # encoder (source) sequence length
D = 32         # d_model (== `size`)
H = 4          # attention heads
D_K = D // H   # per-head dim
D_FF = 64      # feed-forward hidden dim
LN_EPS = 1e-5  # nn.LayerNorm default

# ---- packed weight slab layout (each weight in a 128-aligned column slot) ----
_W_SELF_QKV = 0      # (D, 3D) = (32, 96)
_W_SELF_O   = 128    # (32, 32)
_W_CROSS_Q  = 256    # (32, 32)
_W_CROSS_KV = 384    # (32, 64)
_W_CROSS_O  = 512    # (32, 32)
_W_FF1      = 640    # (32, 64)
_W_SLAB_COLS = 768

# ---- packed bias / LayerNorm-parameter slab layout (rows padded to 96) -------
_P_LN0_G, _P_LN0_B = 0, 1
_P_LN1_G, _P_LN1_B = 2, 3
_P_LN2_G, _P_LN2_B = 4, 5
_P_B_SELF_QKV = 6
_P_B_SELF_O = 7
_P_B_CROSS_Q = 8
_P_B_CROSS_KV = 9
_P_B_CROSS_O = 10
_P_B_FF1 = 11
_P_B_FF2 = 12
_P_ROWS = 13
_P_COLS = 3 * D      # 96


# -----------------------------------------------------------------------------
# Fused decoder-layer kernel (whole layer, no grid, everything resident in VMEM)
# -----------------------------------------------------------------------------
def _decoder_layer_kernel(x_ref, enc_ref, mut_ref, wt_ref,
                          w_ref, w_ff2_ref, p_ref, o_ref):
    t = B * S
    t_src = B * S_SRC
    scale = 1.0 / math.sqrt(D_K)
    neg = jnp.float32(-1e9)

    def prow(r, width):
        # one parameter row from the packed slab -> (1, width), broadcasts over tokens
        return p_ref[r:r + 1, :width]

    def layernorm(z, g, b):
        # var = E[x^2] - E[x]^2 : two independent lane reductions (shorter XLU chain)
        m = jnp.mean(z, axis=-1, keepdims=True)
        m2 = jnp.mean(z * z, axis=-1, keepdims=True)
        var = m2 - m * m
        return (z - m) * jax.lax.rsqrt(var + LN_EPS) * g + b

    def mha(q_flat, k_flat, v_flat, bias, sq, sk):
        # q_flat: (B*sq, D), k_flat/v_flat: (B*sk, D) with head-major columns,
        # bias: (B, sq, sk) additive (0 / -1e9).  Static loop over H=4 heads;
        # each contraction stays batched over B.
        ctx_heads = []
        for h in range(H):
            lo, hi = h * D_K, (h + 1) * D_K
            q = q_flat[:, lo:hi].reshape(B, sq, D_K)
            k = k_flat[:, lo:hi].reshape(B, sk, D_K)
            v = v_flat[:, lo:hi].reshape(B, sk, D_K)
            s = jnp.einsum('bqd,bkd->bqk', q, k,
                           preferred_element_type=jnp.float32) * scale + bias
            # NOTE: a fully-masked row yields a uniform distribution, matching
            # the reference masked_fill(-1e9) + softmax behavior.
            s = s - jnp.max(s, axis=-1, keepdims=True)
            p = jnp.exp(s)
            p = p * pl.reciprocal(jnp.sum(p, axis=-1, keepdims=True), approx=False)
            ctx = jnp.einsum('bqk,bkd->bqd', p, v,
                             preferred_element_type=jnp.float32)
            ctx_heads.append(ctx.reshape(B * sq, D_K))
        return jnp.concatenate(ctx_heads, axis=-1)          # (B*sq, D), head-major

    # residual stream, batch folded into the token (sublane) dimension
    x = x_ref[...].astype(jnp.float32).reshape(t, D)          # (16, 32)
    enc = enc_ref[...].astype(jnp.float32).reshape(t_src, D)  # (16, 32)

    # mask -> additive bias, computed in-kernel (one select each)
    self_bias = jnp.where(mut_ref[...] > 0, jnp.float32(0.0), neg)   # (B, S, S)
    cross_bias = jnp.where(wt_ref[...] > 0, jnp.float32(0.0), neg)   # (B, S, S_SRC)

    # ---- sublayer 0: pre-norm self-attention + residual ----------------------
    xn = layernorm(x, prow(_P_LN0_G, D), prow(_P_LN0_B, D))
    qkv = jnp.dot(xn, w_ref[:, _W_SELF_QKV:_W_SELF_QKV + 3 * D],
                  preferred_element_type=jnp.float32) + prow(_P_B_SELF_QKV, 3 * D)
    ctx = mha(qkv[:, :D], qkv[:, D:2 * D], qkv[:, 2 * D:3 * D], self_bias, S, S)
    x = x + jnp.dot(ctx, w_ref[:, _W_SELF_O:_W_SELF_O + D],
                    preferred_element_type=jnp.float32) + prow(_P_B_SELF_O, D)

    # ---- sublayer 1: pre-norm cross-attention + residual ---------------------
    # queries from LN1(x); keys/values from raw enc_out (not normed)
    xn = layernorm(x, prow(_P_LN1_G, D), prow(_P_LN1_B, D))
    q = jnp.dot(xn, w_ref[:, _W_CROSS_Q:_W_CROSS_Q + D],
                preferred_element_type=jnp.float32) + prow(_P_B_CROSS_Q, D)
    kv = jnp.dot(enc, w_ref[:, _W_CROSS_KV:_W_CROSS_KV + 2 * D],
                 preferred_element_type=jnp.float32) + prow(_P_B_CROSS_KV, 2 * D)
    ctx = mha(q, kv[:, :D], kv[:, D:2 * D], cross_bias, S, S_SRC)
    x = x + jnp.dot(ctx, w_ref[:, _W_CROSS_O:_W_CROSS_O + D],
                    preferred_element_type=jnp.float32) + prow(_P_B_CROSS_O, D)

    # ---- sublayer 2: pre-norm feed-forward + residual -------------------------
    xn = layernorm(x, prow(_P_LN2_G, D), prow(_P_LN2_B, D))
    h1 = jnp.maximum(
        jnp.dot(xn, w_ref[:, _W_FF1:_W_FF1 + D_FF],
                preferred_element_type=jnp.float32) + prow(_P_B_FF1, D_FF),
        0.0)
    x = x + jnp.dot(h1, w_ff2_ref[...],
                    preferred_element_type=jnp.float32) + prow(_P_B_FF2, D)

    # single contiguous (2, 8, 32) store
    o_ref[...] = x.reshape(B, S, D).astype(o_ref.dtype)


# -----------------------------------------------------------------------------
# Wrapper: single pallas_call, all 7 packed inputs resident in VMEM
# -----------------------------------------------------------------------------
def decoder_layer(params, x, enc_out, wt_mask, mut_mask):
    args = (x, enc_out,
            mut_mask.astype(jnp.float32), wt_mask.astype(jnp.float32),
            params["w_slab"], params["ff_w2"], params["p_slab"])
    vmem = pltpu.MemorySpace.VMEM
    return pl.pallas_call(
        _decoder_layer_kernel,
        out_shape=jax.ShapeDtypeStruct(x.shape, x.dtype),
        in_specs=[pl.BlockSpec(memory_space=vmem) for _ in args],
        out_specs=pl.BlockSpec(memory_space=vmem),
    )(*args)


# -----------------------------------------------------------------------------
# Parameter construction (deterministic nn.Linear-style uniform init), then
# wrapper-side packing into the weight slab and the bias/LN slab.
# -----------------------------------------------------------------------------
def _linear_params(key, fan_in, fan_out):
    kw, kb = jax.random.split(key)
    bound = 1.0 / math.sqrt(fan_in)
    w = jax.random.uniform(kw, (fan_in, fan_out), jnp.float32, -bound, bound)
    b = jax.random.uniform(kb, (fan_out,), jnp.float32, -bound, bound)
    return w, b


def _pad_cols(w, width):
    return jnp.pad(w, ((0, 0), (0, width - w.shape[1])))


def _pad_row(v, width=_P_COLS):
    return jnp.pad(v, (0, width - v.shape[0]))[None, :]


def make_decoder_layer_params(key):
    ks = jax.random.split(key, 10)
    wq, bq = _linear_params(ks[0], D, D)
    wk, bk = _linear_params(ks[1], D, D)
    wv, bv = _linear_params(ks[2], D, D)
    wo, bo = _linear_params(ks[3], D, D)
    cq, cbq = _linear_params(ks[4], D, D)
    ck, cbk = _linear_params(ks[5], D, D)
    cv, cbv = _linear_params(ks[6], D, D)
    co, cbo = _linear_params(ks[7], D, D)
    w1, b1 = _linear_params(ks[8], D, D_FF)
    w2, b2 = _linear_params(ks[9], D_FF, D)

    # one weight slab, every weight starts on a 128-lane boundary
    w_slab = jnp.concatenate([
        _pad_cols(jnp.concatenate([wq, wk, wv], axis=1), 128),  # self Q|K|V
        _pad_cols(wo, 128),                                     # self out proj
        _pad_cols(cq, 128),                                     # cross Q
        _pad_cols(jnp.concatenate([ck, cv], axis=1), 128),      # cross K|V
        _pad_cols(co, 128),                                     # cross out proj
        _pad_cols(w1, 128),                                     # FFN W1
    ], axis=1)                                                  # (32, 768)
    assert w_slab.shape == (D, _W_SLAB_COLS)

    # one bias / LayerNorm-parameter slab (rows padded to 96 lanes)
    p_slab = jnp.concatenate([
        _pad_row(jnp.ones((D,), jnp.float32)),    # ln0 gamma
        _pad_row(jnp.zeros((D,), jnp.float32)),   # ln0 beta
        _pad_row(jnp.ones((D,), jnp.float32)),    # ln1 gamma
        _pad_row(jnp.zeros((D,), jnp.float32)),   # ln1 beta
        _pad_row(jnp.ones((D,), jnp.float32)),    # ln2 gamma
        _pad_row(jnp.zeros((D,), jnp.float32)),   # ln2 beta
        _pad_row(jnp.concatenate([bq, bk, bv])),  # self Q|K|V bias (96)
        _pad_row(bo),                             # self out bias
        _pad_row(cbq),                            # cross Q bias
        _pad_row(jnp.concatenate([cbk, cbv])),    # cross K|V bias (64)
        _pad_row(cbo),                            # cross out bias
        _pad_row(b1),                             # FFN b1 (64)
        _pad_row(b2),                             # FFN b2
    ], axis=0)                                    # (13, 96)
    assert p_slab.shape == (_P_ROWS, _P_COLS)

    return dict(w_slab=w_slab, ff_w2=w2, p_slab=p_slab)


# -----------------------------------------------------------------------------
if __name__ == "__main__":
    key = jax.random.PRNGKey(0)
    k_params, k_x, k_enc = jax.random.split(key, 3)

    params = make_decoder_layer_params(k_params)

    x = jax.random.normal(k_x, (B, S, D), jnp.float32)
    enc_out = jax.random.normal(k_enc, (B, S_SRC, D), jnp.float32)

    # mut_mask: causal mask for decoder self-attention, (B, S, S); 1 = keep
    causal = jnp.tril(jnp.ones((S, S), jnp.float32))
    mut_mask = jnp.broadcast_to(causal, (B, S, S))
    # wt_mask: source (encoder) padding mask, (B, S, S_SRC); all-ones here
    wt_mask = jnp.ones((B, S, S_SRC), jnp.float32)

    out = decoder_layer(params, x, enc_out, wt_mask, mut_mask)
    out = jax.block_until_ready(out)

    assert out.shape == (B, S, D)
    assert bool(jnp.all(jnp.isfinite(out)))
    print("KERNEL_OK")
</pallas_src>

<mosaic_0001>
module attributes {stable_mosaic.version = 11 : i64} {
  func.func @_decoder_layer_kernel(%arg0: memref<2x8x32xf32, #tpu.memory_space<vmem>>, %arg1: memref<2x8x32xf32, #tpu.memory_space<vmem>>, %arg2: memref<2x8x8xf32, #tpu.memory_space<vmem>>, %arg3: memref<2x8x8xf32, #tpu.memory_space<vmem>>, %arg4: memref<32x768xf32, #tpu.memory_space<vmem>>, %arg5: memref<64x32xf32, #tpu.memory_space<vmem>>, %arg6: memref<13x96xf32, #tpu.memory_space<vmem>>, %arg7: memref<2x8x32xf32, #tpu.memory_space<vmem>>) attributes {dimension_semantics = [], scalar_prefetch = 0 : i64, scratch_operands = 0 : i64, tpu.core_type = #tpu.core_type<tc>} {
    %c0 = arith.constant 0 : index
    %c0_0 = arith.constant 0 : index
    %c0_1 = arith.constant 0 : index
    %0 = vector.load %arg0[%c0, %c0_0, %c0_1] : memref<2x8x32xf32, #tpu.memory_space<vmem>>, vector<2x8x32xf32>
    %1 = vector.shape_cast %0 : vector<2x8x32xf32> to vector<16x32xf32>
    %c0_2 = arith.constant 0 : index
    %c0_3 = arith.constant 0 : index
    %c0_4 = arith.constant 0 : index
    %2 = vector.load %arg1[%c0_2, %c0_3, %c0_4] : memref<2x8x32xf32, #tpu.memory_space<vmem>>, vector<2x8x32xf32>
    %3 = vector.shape_cast %2 : vector<2x8x32xf32> to vector<16x32xf32>
    %c0_5 = arith.constant 0 : index
    %c0_6 = arith.constant 0 : index
    %c0_7 = arith.constant 0 : index
    %4 = vector.load %arg2[%c0_5, %c0_6, %c0_7] : memref<2x8x8xf32, #tpu.memory_space<vmem>>, vector<2x8x8xf32>
    %cst = arith.constant 0.000000e+00 : f32
    %5 = vector.broadcast %cst : f32 to vector<2x8x8xf32>
    %6 = arith.cmpf ogt, %4, %5 : vector<2x8x8xf32>
    %cst_8 = arith.constant 0.000000e+00 : f32
    %cst_9 = arith.constant -1.000000e+09 : f32
    %7 = vector.broadcast %cst_8 : f32 to vector<2x8x8xf32>
    %8 = vector.broadcast %cst_9 : f32 to vector<2x8x8xf32>
    %9 = arith.select %6, %7, %8 : vector<2x8x8xi1>, vector<2x8x8xf32>
    %c0_10 = arith.constant 0 : index
    %c0_11 = arith.constant 0 : index
    %c0_12 = arith.constant 0 : index
    %10 = vector.load %arg3[%c0_10, %c0_11, %c0_12] : memref<2x8x8xf32, #tpu.memory_space<vmem>>, vector<2x8x8xf32>
    %cst_13 = arith.constant 0.000000e+00 : f32
    %11 = vector.broadcast %cst_13 : f32 to vector<2x8x8xf32>
    %12 = arith.cmpf ogt, %10, %11 : vector<2x8x8xf32>
    %cst_14 = arith.constant 0.000000e+00 : f32
    %cst_15 = arith.constant -1.000000e+09 : f32
    %13 = vector.broadcast %cst_14 : f32 to vector<2x8x8xf32>
    %14 = vector.broadcast %cst_15 : f32 to vector<2x8x8xf32>
    %15 = arith.select %12, %13, %14 : vector<2x8x8xi1>, vector<2x8x8xf32>
    %c0_16 = arith.constant 0 : index
    %c0_17 = arith.constant 0 : index
    %16 = vector.load %arg6[%c0_16, %c0_17] : memref<13x96xf32, #tpu.memory_space<vmem>>, vector<1x32xf32>
    %c1 = arith.constant 1 : index
    %c0_18 = arith.constant 0 : index
    %17 = vector.load %arg6[%c1, %c0_18] : memref<13x96xf32, #tpu.memory_space<vmem>>, vector<1x32xf32>
    %cst_19 = arith.constant dense<0.000000e+00> : vector<16xf32>
    %18 = vector.multi_reduction <add>, %1, %cst_19 [1] : vector<16x32xf32> to vector<16xf32>
    %19 = vector.shape_cast %18 : vector<16xf32> to vector<16x1xf32>
    %cst_20 = arith.constant 3.200000e+01 : f32
    %20 = vector.broadcast %cst_20 : f32 to vector<16x1xf32>
    %21 = arith.divf %19, %20 : vector<16x1xf32>
    %22 = arith.mulf %1, %1 : vector<16x32xf32>
    %cst_21 = arith.constant dense<0.000000e+00> : vector<16xf32>
    %23 = vector.multi_reduction <add>, %22, %cst_21 [1] : vector<16x32xf32> to vector<16xf32>
    %24 = vector.shape_cast %23 : vector<16xf32> to vector<16x1xf32>
    %cst_22 = arith.constant 3.200000e+01 : f32
    %25 = vector.broadcast %cst_22 : f32 to vector<16x1xf32>
    %26 = arith.divf %24, %25 : vector<16x1xf32>
    %27 = arith.mulf %21, %21 : vector<16x1xf32>
    %28 = arith.subf %26, %27 : vector<16x1xf32>
    %29 = vector.broadcast %21 : vector<16x1xf32> to vector<16x32xf32>
    %30 = arith.subf %1, %29 : vector<16x32xf32>
    %cst_23 = arith.constant 9.99999974E-6 : f32
    %31 = vector.broadcast %cst_23 : f32 to vector<16x1xf32>
    %32 = arith.addf %28, %31 : vector<16x1xf32>
    %33 = math.rsqrt %32 : vector<16x1xf32>
    %34 = vector.broadcast %33 : vector<16x1xf32> to vector<16x32xf32>
    %35 = arith.mulf %30, %34 : vector<16x32xf32>
    %36 = vector.broadcast %16 : vector<1x32xf32> to vector<16x32xf32>
    %37 = arith.mulf %35, %36 : vector<16x32xf32>
    %38 = vector.broadcast %17 : vector<1x32xf32> to vector<16x32xf32>
    %39 = arith.addf %37, %38 : vector<16x32xf32>
    %c0_24 = arith.constant 0 : index
    %c0_25 = arith.constant 0 : index
    %40 = vector.load %arg4[%c0_24, %c0_25] : memref<32x768xf32, #tpu.memory_space<vmem>>, vector<32x96xf32>
    %cst_26 = arith.constant dense<0.000000e+00> : vector<16x96xf32>
    %41 = tpu.matmul %39, %40, %cst_26 {dimension_numbers = #tpu.dot_dimension_numbers<[1], [0], [0], [1], [0, 0, 1, 1], [], []>} : vector<16x32xf32>, vector<32x96xf32>, vector<16x96xf32> -> vector<16x96xf32>
    %c6 = arith.constant 6 : index
    %c0_27 = arith.constant 0 : index
    %42 = vector.load %arg6[%c6, %c0_27] : memref<13x96xf32, #tpu.memory_space<vmem>>, vector<1x96xf32>
    %43 = vector.broadcast %42 : vector<1x96xf32> to vector<16x96xf32>
    %44 = arith.addf %41, %43 : vector<16x96xf32>
    %45 = vector.extract_strided_slice %44 {offsets = [0, 0], sizes = [16, 32], strides = [1, 1]} : vector<16x96xf32> to vector<16x32xf32>
    %46 = vector.extract_strided_slice %44 {offsets = [0, 32], sizes = [16, 32], strides = [1, 1]} : vector<16x96xf32> to vector<16x32xf32>
    %47 = vector.extract_strided_slice %44 {offsets = [0, 64], sizes = [16, 32], strides = [1, 1]} : vector<16x96xf32> to vector<16x32xf32>
    %48 = vector.extract_strided_slice %45 {offsets = [0, 0], sizes = [16, 8], strides = [1, 1]} : vector<16x32xf32> to vector<16x8xf32>
    %49 = vector.shape_cast %48 : vector<16x8xf32> to vector<2x8x8xf32>
    %50 = vector.extract_strided_slice %46 {offsets = [0, 0], sizes = [16, 8], strides = [1, 1]} : vector<16x32xf32> to vector<16x8xf32>
    %51 = vector.shape_cast %50 : vector<16x8xf32> to vector<2x8x8xf32>
    %52 = vector.extract_strided_slice %47 {offsets = [0, 0], sizes = [16, 8], strides = [1, 1]} : vector<16x32xf32> to vector<16x8xf32>
    %53 = vector.shape_cast %52 : vector<16x8xf32> to vector<2x8x8xf32>
    "tpu.trace_start"() <{level = 10 : i32, message = "bqd,bkd->bqk"}> : () -> ()
    %cst_28 = arith.constant dense<0.000000e+00> : vector<2x8x8xf32>
    %54 = tpu.matmul %49, %51, %cst_28 {dimension_numbers = #tpu.dot_dimension_numbers<[2], [2], [1], [1], [0, 0, 0, 1, 1, 1], [0], [0]>} : vector<2x8x8xf32>, vector<2x8x8xf32>, vector<2x8x8xf32> -> vector<2x8x8xf32>
    "tpu.trace_stop"() : () -> ()
    %cst_29 = arith.constant 0.353553385 : f32
    %55 = vector.broadcast %cst_29 : f32 to vector<2x8x8xf32>
    %56 = arith.mulf %54, %55 : vector<2x8x8xf32>
    %57 = arith.addf %56, %9 : vector<2x8x8xf32>
    %cst_30 = arith.constant dense<0xFF800000> : vector<2x8xf32>
    %58 = vector.multi_reduction <maximumf>, %57, %cst_30 [2] : vector<2x8x8xf32> to vector<2x8xf32>
    %59 = vector.shape_cast %58 : vector<2x8xf32> to vector<2x8x1xf32>
    %60 = vector.broadcast %59 : vector<2x8x1xf32> to vector<2x8x8xf32>
    %61 = arith.subf %57, %60 : vector<2x8x8xf32>
    %62 = math.exp %61 : vector<2x8x8xf32>
    %cst_31 = arith.constant dense<0.000000e+00> : vector<2x8xf32>
    %63 = vector.multi_reduction <add>, %62, %cst_31 [2] : vector<2x8x8xf32> to vector<2x8xf32>
    %64 = vector.shape_cast %63 : vector<2x8xf32> to vector<2x8x1xf32>
    %65 = tpu.reciprocal %64 : vector<2x8x1xf32> -> vector<2x8x1xf32>
    %66 = vector.broadcast %65 : vector<2x8x1xf32> to vector<2x8x8xf32>
    %67 = arith.mulf %62, %66 : vector<2x8x8xf32>
    "tpu.trace_start"() <{level = 10 : i32, message = "bqk,bkd->bqd"}> : () -> ()
    %cst_32 = arith.constant dense<0.000000e+00> : vector<2x8x8xf32>
    %68 = tpu.matmul %67, %53, %cst_32 {dimension_numbers = #tpu.dot_dimension_numbers<[2], [1], [1], [2], [0, 0, 0, 1, 1, 2], [0], [0]>} : vector<2x8x8xf32>, vector<2x8x8xf32>, vector<2x8x8xf32> -> vector<2x8x8xf32>
    "tpu.trace_stop"() : () -> ()
    %69 = vector.shape_cast %68 : vector<2x8x8xf32> to vector<16x8xf32>
    %70 = vector.extract_strided_slice %45 {offsets = [0, 8], sizes = [16, 8], strides = [1, 1]} : vector<16x32xf32> to vector<16x8xf32>
    %71 = vector.shape_cast %70 : vector<16x8xf32> to vector<2x8x8xf32>
    %72 = vector.extract_strided_slice %46 {offsets = [0, 8], sizes = [16, 8], strides = [1, 1]} : vector<16x32xf32> to vector<16x8xf32>
    %73 = vector.shape_cast %72 : vector<16x8xf32> to vector<2x8x8xf32>
    %74 = vector.extract_strided_slice %47 {offsets = [0, 8], sizes = [16, 8], strides = [1, 1]} : vector<16x32xf32> to vector<16x8xf32>
    %75 = vector.shape_cast %74 : vector<16x8xf32> to vector<2x8x8xf32>
    "tpu.trace_start"() <{level = 10 : i32, message = "bqd,bkd->bqk"}> : () -> ()
    %cst_33 = arith.constant dense<0.000000e+00> : vector<2x8x8xf32>
    %76 = tpu.matmul %71, %73, %cst_33 {dimension_numbers = #tpu.dot_dimension_numbers<[2], [2], [1], [1], [0, 0, 0, 1, 1, 1], [0], [0]>} : vector<2x8x8xf32>, vector<2x8x8xf32>, vector<2x8x8xf32> -> vector<2x8x8xf32>
    "tpu.trace_stop"() : () -> ()
    %cst_34 = arith.constant 0.353553385 : f32
    %77 = vector.broadcast %cst_34 : f32 to vector<2x8x8xf32>
    %78 = arith.mulf %76, %77 : vector<2x8x8xf32>
    %79 = arith.addf %78, %9 : vector<2x8x8xf32>
    %cst_35 = arith.constant dense<0xFF800000> : vector<2x8xf32>
    %80 = vector.multi_reduction <maximumf>, %79, %cst_35 [2] : vector<2x8x8xf32> to vector<2x8xf32>
    %81 = vector.shape_cast %80 : vector<2x8xf32> to vector<2x8x1xf32>
    %82 = vector.broadcast %81 : vector<2x8x1xf32> to vector<2x8x8xf32>
    %83 = arith.subf %79, %82 : vector<2x8x8xf32>
    %84 = math.exp %83 : vector<2x8x8xf32>
    %cst_36 = arith.constant dense<0.000000e+00> : vector<2x8xf32>
    %85 = vector.multi_reduction <add>, %84, %cst_36 [2] : vector<2x8x8xf32> to vector<2x8xf32>
    %86 = vector.shape_cast %85 : vector<2x8xf32> to vector<2x8x1xf32>
    %87 = tpu.reciprocal %86 : vector<2x8x1xf32> -> vector<2x8x1xf32>
    %88 = vector.broadcast %87 : vector<2x8x1xf32> to vector<2x8x8xf32>
    %89 = arith.mulf %84, %88 : vector<2x8x8xf32>
    "tpu.trace_start"() <{level = 10 : i32, message = "bqk,bkd->bqd"}> : () -> ()
    %cst_37 = arith.constant dense<0.000000e+00> : vector<2x8x8xf32>
    %90 = tpu.matmul %89, %75, %cst_37 {dimension_numbers = #tpu.dot_dimension_numbers<[2], [1], [1], [2], [0, 0, 0, 1, 1, 2], [0], [0]>} : vector<2x8x8xf32>, vector<2x8x8xf32>, vector<2x8x8xf32> -> vector<2x8x8xf32>
    "tpu.trace_stop"() : () -> ()
    %91 = vector.shape_cast %90 : vector<2x8x8xf32> to vector<16x8xf32>
    %92 = vector.extract_strided_slice %45 {offsets = [0, 16], sizes = [16, 8], strides = [1, 1]} : vector<16x32xf32> to vector<16x8xf32>
    %93 = vector.shape_cast %92 : vector<16x8xf32> to vector<2x8x8xf32>
    %94 = vector.extract_strided_slice %46 {offsets = [0, 16], sizes = [16, 8], strides = [1, 1]} : vector<16x32xf32> to vector<16x8xf32>
    %95 = vector.shape_cast %94 : vector<16x8xf32> to vector<2x8x8xf32>
    %96 = vector.extract_strided_slice %47 {offsets = [0, 16], sizes = [16, 8], strides = [1, 1]} : vector<16x32xf32> to vector<16x8xf32>
    %97 = vector.shape_cast %96 : vector<16x8xf32> to vector<2x8x8xf32>
    "tpu.trace_start"() <{level = 10 : i32, message = "bqd,bkd->bqk"}> : () -> ()
    %cst_38 = arith.constant dense<0.000000e+00> : vector<2x8x8xf32>
    %98 = tpu.matmul %93, %95, %cst_38 {dimension_numbers = #tpu.dot_dimension_numbers<[2], [2], [1], [1], [0, 0, 0, 1, 1, 1], [0], [0]>} : vector<2x8x8xf32>, vector<2x8x8xf32>, vector<2x8x8xf32> -> vector<2x8x8xf32>
    "tpu.trace_stop"() : () -> ()
    %cst_39 = arith.constant 0.353553385 : f32
    %99 = vector.broadcast %cst_39 : f32 to vector<2x8x8xf32>
    %100 = arith.mulf %98, %99 : vector<2x8x8xf32>
    %101 = arith.addf %100, %9 : vector<2x8x8xf32>
    %cst_40 = arith.constant dense<0xFF800000> : vector<2x8xf32>
    %102 = vector.multi_reduction <maximumf>, %101, %cst_40 [2] : vector<2x8x8xf32> to vector<2x8xf32>
    %103 = vector.shape_cast %102 : vector<2x8xf32> to vector<2x8x1xf32>
    %104 = vector.broadcast %103 : vector<2x8x1xf32> to vector<2x8x8xf32>
    %105 = arith.subf %101, %104 : vector<2x8x8xf32>
    %106 = math.exp %105 : vector<2x8x8xf32>
    %cst_41 = arith.constant dense<0.000000e+00> : vector<2x8xf32>
    %107 = vector.multi_reduction <add>, %106, %cst_41 [2] : vector<2x8x8xf32> to vector<2x8xf32>
    %108 = vector.shape_cast %107 : vector<2x8xf32> to vector<2x8x1xf32>
    %109 = tpu.reciprocal %108 : vector<2x8x1xf32> -> vector<2x8x1xf32>
    %110 = vector.broadcast %109 : vector<2x8x1xf32> to vector<2x8x8xf32>
    %111 = arith.mulf %106, %110 : vector<2x8x8xf32>
    "tpu.trace_start"() <{level = 10 : i32, message = "bqk,bkd->bqd"}> : () -> ()
    %cst_42 = arith.constant dense<0.000000e+00> : vector<2x8x8xf32>
    %112 = tpu.matmul %111, %97, %cst_42 {dimension_numbers = #tpu.dot_dimension_numbers<[2], [1], [1], [2], [0, 0, 0, 1, 1, 2], [0], [0]>} : vector<2x8x8xf32>, vector<2x8x8xf32>, vector<2x8x8xf32> -> vector<2x8x8xf32>
    "tpu.trace_stop"() : () -> ()
    %113 = vector.shape_cast %112 : vector<2x8x8xf32> to vector<16x8xf32>
    %114 = vector.extract_strided_slice %45 {offsets = [0, 24], sizes = [16, 8], strides = [1, 1]} : vector<16x32xf32> to vector<16x8xf32>
    %115 = vector.shape_cast %114 : vector<16x8xf32> to vector<2x8x8xf32>
    %116 = vector.extract_strided_slice %46 {offsets = [0, 24], sizes = [16, 8], strides = [1, 1]} : vector<16x32xf32> to vector<16x8xf32>
    %117 = vector.shape_cast %116 : vector<16x8xf32> to vector<2x8x8xf32>
    %118 = vector.extract_strided_slice %47 {offsets = [0, 24], sizes = [16, 8], strides = [1, 1]} : vector<16x32xf32> to vector<16x8xf32>
    %119 = vector.shape_cast %118 : vector<16x8xf32> to vector<2x8x8xf32>
    "tpu.trace_start"() <{level = 10 : i32, message = "bqd,bkd->bqk"}> : () -> ()
    %cst_43 = arith.constant dense<0.000000e+00> : vector<2x8x8xf32>
    %120 = tpu.matmul %115, %117, %cst_43 {dimension_numbers = #tpu.dot_dimension_numbers<[2], [2], [1], [1], [0, 0, 0, 1, 1, 1], [0], [0]>} : vector<2x8x8xf32>, vector<2x8x8xf32>, vector<2x8x8xf32> -> vector<2x8x8xf32>
    "tpu.trace_stop"() : () -> ()
    %cst_44 = arith.constant 0.353553385 : f32
    %121 = vector.broadcast %cst_44 : f32 to vector<2x8x8xf32>
    %122 = arith.mulf %120, %121 : vector<2x8x8xf32>
    %123 = arith.addf %122, %9 : vector<2x8x8xf32>
    %cst_45 = arith.constant dense<0xFF800000> : vector<2x8xf32>
    %124 = vector.multi_reduction <maximumf>, %123, %cst_45 [2] : vector<2x8x8xf32> to vector<2x8xf32>
    %125 = vector.shape_cast %124 : vector<2x8xf32> to vector<2x8x1xf32>
    %126 = vector.broadcast %125 : vector<2x8x1xf32> to vector<2x8x8xf32>
    %127 = arith.subf %123, %126 : vector<2x8x8xf32>
    %128 = math.exp %127 : vector<2x8x8xf32>
    %cst_46 = arith.constant dense<0.000000e+00> : vector<2x8xf32>
    %129 = vector.multi_reduction <add>, %128, %cst_46 [2] : vector<2x8x8xf32> to vector<2x8xf32>
    %130 = vector.shape_cast %129 : vector<2x8xf32> to vector<2x8x1xf32>
    %131 = tpu.reciprocal %130 : vector<2x8x1xf32> -> vector<2x8x1xf32>
    %132 = vector.broadcast %131 : vector<2x8x1xf32> to vector<2x8x8xf32>
    %133 = arith.mulf %128, %132 : vector<2x8x8xf32>
    "tpu.trace_start"() <{level = 10 : i32, message = "bqk,bkd->bqd"}> : () -> ()
    %cst_47 = arith.constant dense<0.000000e+00> : vector<2x8x8xf32>
    %134 = tpu.matmul %133, %119, %cst_47 {dimension_numbers = #tpu.dot_dimension_numbers<[2], [1], [1], [2], [0, 0, 0, 1, 1, 2], [0], [0]>} : vector<2x8x8xf32>, vector<2x8x8xf32>, vector<2x8x8xf32> -> vector<2x8x8xf32>
    "tpu.trace_stop"() : () -> ()
    %135 = vector.shape_cast %134 : vector<2x8x8xf32> to vector<16x8xf32>
    %136 = tpu.concatenate %69, %91, %113, %135 in 1 : vector<16x8xf32>, vector<16x8xf32>, vector<16x8xf32>, vector<16x8xf32> -> vector<16x32xf32>
    %c0_48 = arith.constant 0 : index
    %c128 = arith.constant 128 : index
    %137 = vector.load %arg4[%c0_48, %c128] : memref<32x768xf32, #tpu.memory_space<vmem>>, vector<32x32xf32>
    %cst_49 = arith.constant dense<0.000000e+00> : vector<16x32xf32>
    %138 = tpu.matmul %136, %137, %cst_49 {dimension_numbers = #tpu.dot_dimension_numbers<[1], [0], [0], [1], [0, 0, 1, 1], [], []>} : vector<16x32xf32>, vector<32x32xf32>, vector<16x32xf32> -> vector<16x32xf32>
    %139 = arith.addf %1, %138 : vector<16x32xf32>
    %c7 = arith.constant 7 : index
    %c0_50 = arith.constant 0 : index
    %140 = vector.load %arg6[%c7, %c0_50] : memref<13x96xf32, #tpu.memory_space<vmem>>, vector<1x32xf32>
    %141 = vector.broadcast %140 : vector<1x32xf32> to vector<16x32xf32>
    %142 = arith.addf %139, %141 : vector<16x32xf32>
    %c2 = arith.constant 2 : index
    %c0_51 = arith.constant 0 : index
    %143 = vector.load %arg6[%c2, %c0_51] : memref<13x96xf32, #tpu.memory_space<vmem>>, vector<1x32xf32>
    %c3 = arith.constant 3 : index
    %c0_52 = arith.constant 0 : index
    %144 = vector.load %arg6[%c3, %c0_52] : memref<13x96xf32, #tpu.memory_space<vmem>>, vector<1x32xf32>
    %cst_53 = arith.constant dense<0.000000e+00> : vector<16xf32>
    %145 = vector.multi_reduction <add>, %142, %cst_53 [1] : vector<16x32xf32> to vector<16xf32>
    %146 = vector.shape_cast %145 : vector<16xf32> to vector<16x1xf32>
    %cst_54 = arith.constant 3.200000e+01 : f32
    %147 = vector.broadcast %cst_54 : f32 to vector<16x1xf32>
    %148 = arith.divf %146, %147 : vector<16x1xf32>
    %149 = arith.mulf %142, %142 : vector<16x32xf32>
    %cst_55 = arith.constant dense<0.000000e+00> : vector<16xf32>
    %150 = vector.multi_reduction <add>, %149, %cst_55 [1] : vector<16x32xf32> to vector<16xf32>
    %151 = vector.shape_cast %150 : vector<16xf32> to vector<16x1xf32>
    %cst_56 = arith.constant 3.200000e+01 : f32
    %152 = vector.broadcast %cst_56 : f32 to vector<16x1xf32>
    %153 = arith.divf %151, %152 : vector<16x1xf32>
    %154 = arith.mulf %148, %148 : vector<16x1xf32>
    %155 = arith.subf %153, %154 : vector<16x1xf32>
    %156 = vector.broadcast %148 : vector<16x1xf32> to vector<16x32xf32>
    %157 = arith.subf %142, %156 : vector<16x32xf32>
    %cst_57 = arith.constant 9.99999974E-6 : f32
    %158 = vector.broadcast %cst_57 : f32 to vector<16x1xf32>
    %159 = arith.addf %155, %158 : vector<16x1xf32>
    %160 = math.rsqrt %159 : vector<16x1xf32>
    %161 = vector.broadcast %160 : vector<16x1xf32> to vector<16x32xf32>
    %162 = arith.mulf %157, %161 : vector<16x32xf32>
    %163 = vector.broadcast %143 : vector<1x32xf32> to vector<16x32xf32>
    %164 = arith.mulf %162, %163 : vector<16x32xf32>
    %165 = vector.broadcast %144 : vector<1x32xf32> to vector<16x32xf32>
    %166 = arith.addf %164, %165 : vector<16x32xf32>
    %c0_58 = arith.constant 0 : index
    %c256 = arith.constant 256 : index
    %167 = vector.load %arg4[%c0_58, %c256] : memref<32x768xf32, #tpu.memory_space<vmem>>, vector<32x32xf32>
    %cst_59 = arith.constant dense<0.000000e+00> : vector<16x32xf32>
    %168 = tpu.matmul %166, %167, %cst_59 {dimension_numbers = #tpu.dot_dimension_numbers<[1], [0], [0], [1], [0, 0, 1, 1], [], []>} : vector<16x32xf32>, vector<32x32xf32>, vector<16x32xf32> -> vector<16x32xf32>
    %c8 = arith.constant 8 : index
    %c0_60 = arith.constant 0 : index
    %169 = vector.load %arg6[%c8, %c0_60] : memref<13x96xf32, #tpu.memory_space<vmem>>, vector<1x32xf32>
    %170 = vector.broadcast %169 : vector<1x32xf32> to vector<16x32xf32>
    %171 = arith.addf %168, %170 : vector<16x32xf32>
    %c0_61 = arith.constant 0 : index
    %c384 = arith.constant 384 : index
    %172 = vector.load %arg4[%c0_61, %c384] : memref<32x768xf32, #tpu.memory_space<vmem>>, vector<32x64xf32>
    %cst_62 = arith.constant dense<0.000000e+00> : vector<16x64xf32>
    %173 = tpu.matmul %3, %172, %cst_62 {dimension_numbers = #tpu.dot_dimension_numbers<[1], [0], [0], [1], [0, 0, 1, 1], [], []>} : vector<16x32xf32>, vector<32x64xf32>, vector<16x64xf32> -> vector<16x64xf32>
    %c9 = arith.constant 9 : index
    %c0_63 = arith.constant 0 : index
    %174 = vector.load %arg6[%c9, %c0_63] : memref<13x96xf32, #tpu.memory_space<vmem>>, vector<1x64xf32>
    %175 = vector.broadcast %174 : vector<1x64xf32> to vector<16x64xf32>
    %176 = arith.addf %173, %175 : vector<16x64xf32>
    %177 = vector.extract_strided_slice %176 {offsets = [0, 0], sizes = [16, 32], strides = [1, 1]} : vector<16x64xf32> to vector<16x32xf32>
    %178 = vector.extract_strided_slice %176 {offsets = [0, 32], sizes = [16, 32], strides = [1, 1]} : vector<16x64xf32> to vector<16x32xf32>
    %179 = vector.extract_strided_slice %171 {offsets = [0, 0], sizes = [16, 8], strides = [1, 1]} : vector<16x32xf32> to vector<16x8xf32>
    %180 = vector.shape_cast %179 : vector<16x8xf32> to vector<2x8x8xf32>
    %181 = vector.extract_strided_slice %177 {offsets = [0, 0], sizes = [16, 8], strides = [1, 1]} : vector<16x32xf32> to vector<16x8xf32>
    %182 = vector.shape_cast %181 : vector<16x8xf32> to vector<2x8x8xf32>
    %183 = vector.extract_strided_slice %178 {offsets = [0, 0], sizes = [16, 8], strides = [1, 1]} : vector<16x32xf32> to vector<16x8xf32>
    %184 = vector.shape_cast %183 : vector<16x8xf32> to vector<2x8x8xf32>
    "tpu.trace_start"() <{level = 10 : i32, message = "bqd,bkd->bqk"}> : () -> ()
    %cst_64 = arith.constant dense<0.000000e+00> : vector<2x8x8xf32>
    %185 = tpu.matmul %180, %182, %cst_64 {dimension_numbers = #tpu.dot_dimension_numbers<[2], [2], [1], [1], [0, 0, 0, 1, 1, 1], [0], [0]>} : vector<2x8x8xf32>, vector<2x8x8xf32>, vector<2x8x8xf32> -> vector<2x8x8xf32>
    "tpu.trace_stop"() : () -> ()
    %cst_65 = arith.constant 0.353553385 : f32
    %186 = vector.broadcast %cst_65 : f32 to vector<2x8x8xf32>
    %187 = arith.mulf %185, %186 : vector<2x8x8xf32>
    %188 = arith.addf %187, %15 : vector<2x8x8xf32>
    %cst_66 = arith.constant dense<0xFF800000> : vector<2x8xf32>
    %189 = vector.multi_reduction <maximumf>, %188, %cst_66 [2] : vector<2x8x8xf32> to vector<2x8xf32>
    %190 = vector.shape_cast %189 : vector<2x8xf32> to vector<2x8x1xf32>
    %191 = vector.broadcast %190 : vector<2x8x1xf32> to vector<2x8x8xf32>
    %192 = arith.subf %188, %191 : vector<2x8x8xf32>
    %193 = math.exp %192 : vector<2x8x8xf32>
    %cst_67 = arith.constant dense<0.000000e+00> : vector<2x8xf32>
    %194 = vector.multi_reduction <add>, %193, %cst_67 [2] : vector<2x8x8xf32> to vector<2x8xf32>
    %195 = vector.shape_cast %194 : vector<2x8xf32> to vector<2x8x1xf32>
    %196 = tpu.reciprocal %195 : vector<2x8x1xf32> -> vector<2x8x1xf32>
    %197 = vector.broadcast %196 : vector<2x8x1xf32> to vector<2x8x8xf32>
    %198 = arith.mulf %193, %197 : vector<2x8x8xf32>
    "tpu.trace_start"() <{level = 10 : i32, message = "bqk,bkd->bqd"}> : () -> ()
    %cst_68 = arith.constant dense<0.000000e+00> : vector<2x8x8xf32>
    %199 = tpu.matmul %198, %184, %cst_68 {dimension_numbers = #tpu.dot_dimension_numbers<[2], [1], [1], [2], [0, 0, 0, 1, 1, 2], [0], [0]>} : vector<2x8x8xf32>, vector<2x8x8xf32>, vector<2x8x8xf32> -> vector<2x8x8xf32>
    "tpu.trace_stop"() : () -> ()
    %200 = vector.shape_cast %199 : vector<2x8x8xf32> to vector<16x8xf32>
    %201 = vector.extract_strided_slice %171 {offsets = [0, 8], sizes = [16, 8], strides = [1, 1]} : vector<16x32xf32> to vector<16x8xf32>
    %202 = vector.shape_cast %201 : vector<16x8xf32> to vector<2x8x8xf32>
    %203 = vector.extract_strided_slice %177 {offsets = [0, 8], sizes = [16, 8], strides = [1, 1]} : vector<16x32xf32> to vector<16x8xf32>
    %204 = vector.shape_cast %203 : vector<16x8xf32> to vector<2x8x8xf32>
    %205 = vector.extract_strided_slice %178 {offsets = [0, 8], sizes = [16, 8], strides = [1, 1]} : vector<16x32xf32> to vector<16x8xf32>
    %206 = vector.shape_cast %205 : vector<16x8xf32> to vector<2x8x8xf32>
    "tpu.trace_start"() <{level = 10 : i32, message = "bqd,bkd->bqk"}> : () -> ()
    %cst_69 = arith.constant dense<0.000000e+00> : vector<2x8x8xf32>
    %207 = tpu.matmul %202, %204, %cst_69 {dimension_numbers = #tpu.dot_dimension_numbers<[2], [2], [1], [1], [0, 0, 0, 1, 1, 1], [0], [0]>} : vector<2x8x8xf32>, vector<2x8x8xf32>, vector<2x8x8xf32> -> vector<2x8x8xf32>
    "tpu.trace_stop"() : () -> ()
    %cst_70 = arith.constant 0.353553385 : f32
    %208 = vector.broadcast %cst_70 : f32 to vector<2x8x8xf32>
    %209 = arith.mulf %207, %208 : vector<2x8x8xf32>
    %210 = arith.addf %209, %15 : vector<2x8x8xf32>
    %cst_71 = arith.constant dense<0xFF800000> : vector<2x8xf32>
    %211 = vector.multi_reduction <maximumf>, %210, %cst_71 [2] : vector<2x8x8xf32> to vector<2x8xf32>
    %212 = vector.shape_cast %211 : vector<2x8xf32> to vector<2x8x1xf32>
    %213 = vector.broadcast %212 : vector<2x8x1xf32> to vector<2x8x8xf32>
    %214 = arith.subf %210, %213 : vector<2x8x8xf32>
    %215 = math.exp %214 : vector<2x8x8xf32>
    %cst_72 = arith.constant dense<0.000000e+00> : vector<2x8xf32>
    %216 = vector.multi_reduction <add>, %215, %cst_72 [2] : vector<2x8x8xf32> to vector<2x8xf32>
    %217 = vector.shape_cast %216 : vector<2x8xf32> to vector<2x8x1xf32>
    %218 = tpu.reciprocal %217 : vector<2x8x1xf32> -> vector<2x8x1xf32>
    %219 = vector.broadcast %218 : vector<2x8x1xf32> to vector<2x8x8xf32>
    %220 = arith.mulf %215, %219 : vector<2x8x8xf32>
    "tpu.trace_start"() <{level = 10 : i32, message = "bqk,bkd->bqd"}> : () -> ()
    %cst_73 = arith.constant dense<0.000000e+00> : vector<2x8x8xf32>
    %221 = tpu.matmul %220, %206, %cst_73 {dimension_numbers = #tpu.dot_dimension_numbers<[2], [1], [1], [2], [0, 0, 0, 1, 1, 2], [0], [0]>} : vector<2x8x8xf32>, vector<2x8x8xf32>, vector<2x8x8xf32> -> vector<2x8x8xf32>
    "tpu.trace_stop"() : () -> ()
    %222 = vector.shape_cast %221 : vector<2x8x8xf32> to vector<16x8xf32>
    %223 = vector.extract_strided_slice %171 {offsets = [0, 16], sizes = [16, 8], strides = [1, 1]} : vector<16x32xf32> to vector<16x8xf32>
    %224 = vector.shape_cast %223 : vector<16x8xf32> to vector<2x8x8xf32>
    %225 = vector.extract_strided_slice %177 {offsets = [0, 16], sizes = [16, 8], strides = [1, 1]} : vector<16x32xf32> to vector<16x8xf32>
    %226 = vector.shape_cast %225 : vector<16x8xf32> to vector<2x8x8xf32>
    %227 = vector.extract_strided_slice %178 {offsets = [0, 16], sizes = [16, 8], strides = [1, 1]} : vector<16x32xf32> to vector<16x8xf32>
    %228 = vector.shape_cast %227 : vector<16x8xf32> to vector<2x8x8xf32>
    "tpu.trace_start"() <{level = 10 : i32, message = "bqd,bkd->bqk"}> : () -> ()
    %cst_74 = arith.constant dense<0.000000e+00> : vector<2x8x8xf32>
    %229 = tpu.matmul %224, %226, %cst_74 {dimension_numbers = #tpu.dot_dimension_numbers<[2], [2], [1], [1], [0, 0, 0, 1, 1, 1], [0], [0]>} : vector<2x8x8xf32>, vector<2x8x8xf32>, vector<2x8x8xf32> -> vector<2x8x8xf32>
    "tpu.trace_stop"() : () -> ()
    %cst_75 = arith.constant 0.353553385 : f32
    %230 = vector.broadcast %cst_75 : f32 to vector<2x8x8xf32>
    %231 = arith.mulf %229, %230 : vector<2x8x8xf32>
    %232 = arith.addf %231, %15 : vector<2x8x8xf32>
    %cst_76 = arith.constant dense<0xFF800000> : vector<2x8xf32>
    %233 = vector.multi_reduction <maximumf>, %232, %cst_76 [2] : vector<2x8x8xf32> to vector<2x8xf32>
    %234 = vector.shape_cast %233 : vector<2x8xf32> to vector<2x8x1xf32>
    %235 = vector.broadcast %234 : vector<2x8x1xf32> to vector<2x8x8xf32>
    %236 = arith.subf %232, %235 : vector<2x8x8xf32>
    %237 = math.exp %236 : vector<2x8x8xf32>
    %cst_77 = arith.constant dense<0.000000e+00> : vector<2x8xf32>
    %238 = vector.multi_reduction <add>, %237, %cst_77 [2] : vector<2x8x8xf32> to vector<2x8xf32>
    %239 = vector.shape_cast %238 : vector<2x8xf32> to vector<2x8x1xf32>
    %240 = tpu.reciprocal %239 : vector<2x8x1xf32> -> vector<2x8x1xf32>
    %241 = vector.broadcast %240 : vector<2x8x1xf32> to vector<2x8x8xf32>
    %242 = arith.mulf %237, %241 : vector<2x8x8xf32>
    "tpu.trace_start"() <{level = 10 : i32, message = "bqk,bkd->bqd"}> : () -> ()
    %cst_78 = arith.constant dense<0.000000e+00> : vector<2x8x8xf32>
    %243 = tpu.matmul %242, %228, %cst_78 {dimension_numbers = #tpu.dot_dimension_numbers<[2], [1], [1], [2], [0, 0, 0, 1, 1, 2], [0], [0]>} : vector<2x8x8xf32>, vector<2x8x8xf32>, vector<2x8x8xf32> -> vector<2x8x8xf32>
    "tpu.trace_stop"() : () -> ()
    %244 = vector.shape_cast %243 : vector<2x8x8xf32> to vector<16x8xf32>
    %245 = vector.extract_strided_slice %171 {offsets = [0, 24], sizes = [16, 8], strides = [1, 1]} : vector<16x32xf32> to vector<16x8xf32>
    %246 = vector.shape_cast %245 : vector<16x8xf32> to vector<2x8x8xf32>
    %247 = vector.extract_strided_slice %177 {offsets = [0, 24], sizes = [16, 8], strides = [1, 1]} : vector<16x32xf32> to vector<16x8xf32>
    %248 = vector.shape_cast %247 : vector<16x8xf32> to vector<2x8x8xf32>
    %249 = vector.extract_strided_slice %178 {offsets = [0, 24], sizes = [16, 8], strides = [1, 1]} : vector<16x32xf32> to vector<16x8xf32>
    %250 = vector.shape_cast %249 : vector<16x8xf32> to vector<2x8x8xf32>
    "tpu.trace_start"() <{level = 10 : i32, message = "bqd,bkd->bqk"}> : () -> ()
    %cst_79 = arith.constant dense<0.000000e+00> : vector<2x8x8xf32>
    %251 = tpu.matmul %246, %248, %cst_79 {dimension_numbers = #tpu.dot_dimension_numbers<[2], [2], [1], [1], [0, 0, 0, 1, 1, 1], [0], [0]>} : vector<2x8x8xf32>, vector<2x8x8xf32>, vector<2x8x8xf32> -> vector<2x8x8xf32>
    "tpu.trace_stop"() : () -> ()
    %cst_80 = arith.constant 0.353553385 : f32
    %252 = vector.broadcast %cst_80 : f32 to vector<2x8x8xf32>
    %253 = arith.mulf %251, %252 : vector<2x8x8xf32>
    %254 = arith.addf %253, %15 : vector<2x8x8xf32>
    %cst_81 = arith.constant dense<0xFF800000> : vector<2x8xf32>
    %255 = vector.multi_reduction <maximumf>, %254, %cst_81 [2] : vector<2x8x8xf32> to vector<2x8xf32>
    %256 = vector.shape_cast %255 : vector<2x8xf32> to vector<2x8x1xf32>
    %257 = vector.broadcast %256 : vector<2x8x1xf32> to vector<2x8x8xf32>
    %258 = arith.subf %254, %257 : vector<2x8x8xf32>
    %259 = math.exp %258 : vector<2x8x8xf32>
    %cst_82 = arith.constant dense<0.000000e+00> : vector<2x8xf32>
    %260 = vector.multi_reduction <add>, %259, %cst_82 [2] : vector<2x8x8xf32> to vector<2x8xf32>
    %261 = vector.shape_cast %260 : vector<2x8xf32> to vector<2x8x1xf32>
    %262 = tpu.reciprocal %261 : vector<2x8x1xf32> -> vector<2x8x1xf32>
    %263 = vector.broadcast %262 : vector<2x8x1xf32> to vector<2x8x8xf32>
    %264 = arith.mulf %259, %263 : vector<2x8x8xf32>
    "tpu.trace_start"() <{level = 10 : i32, message = "bqk,bkd->bqd"}> : () -> ()
    %cst_83 = arith.constant dense<0.000000e+00> : vector<2x8x8xf32>
    %265 = tpu.matmul %264, %250, %cst_83 {dimension_numbers = #tpu.dot_dimension_numbers<[2], [1], [1], [2], [0, 0, 0, 1, 1, 2], [0], [0]>} : vector<2x8x8xf32>, vector<2x8x8xf32>, vector<2x8x8xf32> -> vector<2x8x8xf32>
    "tpu.trace_stop"() : () -> ()
    %266 = vector.shape_cast %265 : vector<2x8x8xf32> to vector<16x8xf32>
    %267 = tpu.concatenate %200, %222, %244, %266 in 1 : vector<16x8xf32>, vector<16x8xf32>, vector<16x8xf32>, vector<16x8xf32> -> vector<16x32xf32>
    %c0_84 = arith.constant 0 : index
    %c512 = arith.constant 512 : index
    %268 = vector.load %arg4[%c0_84, %c512] : memref<32x768xf32, #tpu.memory_space<vmem>>, vector<32x32xf32>
    %cst_85 = arith.constant dense<0.000000e+00> : vector<16x32xf32>
    %269 = tpu.matmul %267, %268, %cst_85 {dimension_numbers = #tpu.dot_dimension_numbers<[1], [0], [0], [1], [0, 0, 1, 1], [], []>} : vector<16x32xf32>, vector<32x32xf32>, vector<16x32xf32> -> vector<16x32xf32>
    %270 = arith.addf %142, %269 : vector<16x32xf32>
    %c10 = arith.constant 10 : index
    %c0_86 = arith.constant 0 : index
    %271 = vector.load %arg6[%c10, %c0_86] : memref<13x96xf32, #tpu.memory_space<vmem>>, vector<1x32xf32>
    %272 = vector.broadcast %271 : vector<1x32xf32> to vector<16x32xf32>
    %273 = arith.addf %270, %272 : vector<16x32xf32>
    %c4 = arith.constant 4 : index
    %c0_87 = arith.constant 0 : index
    %274 = vector.load %arg6[%c4, %c0_87] : memref<13x96xf32, #tpu.memory_space<vmem>>, vector<1x32xf32>
    %c5 = arith.constant 5 : index
    %c0_88 = arith.constant 0 : index
    %275 = vector.load %arg6[%c5, %c0_88] : memref<13x96xf32, #tpu.memory_space<vmem>>, vector<1x32xf32>
    %cst_89 = arith.constant dense<0.000000e+00> : vector<16xf32>
    %276 = vector.multi_reduction <add>, %273, %cst_89 [1] : vector<16x32xf32> to vector<16xf32>
    %277 = vector.shape_cast %276 : vector<16xf32> to vector<16x1xf32>
    %cst_90 = arith.constant 3.200000e+01 : f32
    %278 = vector.broadcast %cst_90 : f32 to vector<16x1xf32>
    %279 = arith.divf %277, %278 : vector<16x1xf32>
    %280 = arith.mulf %273, %273 : vector<16x32xf32>
    %cst_91 = arith.constant dense<0.000000e+00> : vector<16xf32>
    %281 = vector.multi_reduction <add>, %280, %cst_91 [1] : vector<16x32xf32> to vector<16xf32>
    %282 = vector.shape_cast %281 : vector<16xf32> to vector<16x1xf32>
    %cst_92 = arith.constant 3.200000e+01 : f32
    %283 = vector.broadcast %cst_92 : f32 to vector<16x1xf32>
    %284 = arith.divf %282, %283 : vector<16x1xf32>
    %285 = arith.mulf %279, %279 : vector<16x1xf32>
    %286 = arith.subf %284, %285 : vector<16x1xf32>
    %287 = vector.broadcast %279 : vector<16x1xf32> to vector<16x32xf32>
    %288 = arith.subf %273, %287 : vector<16x32xf32>
    %cst_93 = arith.constant 9.99999974E-6 : f32
    %289 = vector.broadcast %cst_93 : f32 to vector<16x1xf32>
    %290 = arith.addf %286, %289 : vector<16x1xf32>
    %291 = math.rsqrt %290 : vector<16x1xf32>
    %292 = vector.broadcast %291 : vector<16x1xf32> to vector<16x32xf32>
    %293 = arith.mulf %288, %292 : vector<16x32xf32>
    %294 = vector.broadcast %274 : vector<1x32xf32> to vector<16x32xf32>
    %295 = arith.mulf %293, %294 : vector<16x32xf32>
    %296 = vector.broadcast %275 : vector<1x32xf32> to vector<16x32xf32>
    %297 = arith.addf %295, %296 : vector<16x32xf32>
    %c0_94 = arith.constant 0 : index
    %c640 = arith.constant 640 : index
    %298 = vector.load %arg4[%c0_94, %c640] : memref<32x768xf32, #tpu.memory_space<vmem>>, vector<32x64xf32>
    %cst_95 = arith.constant dense<0.000000e+00> : vector<16x64xf32>
    %299 = tpu.matmul %297, %298, %cst_95 {dimension_numbers = #tpu.dot_dimension_numbers<[1], [0], [0], [1], [0, 0, 1, 1], [], []>} : vector<16x32xf32>, vector<32x64xf32>, vector<16x64xf32> -> vector<16x64xf32>
    %c11 = arith.constant 11 : index
    %c0_96 = arith.constant 0 : index
    %300 = vector.load %arg6[%c11, %c0_96] : memref<13x96xf32, #tpu.memory_space<vmem>>, vector<1x64xf32>
    %301 = vector.broadcast %300 : vector<1x64xf32> to vector<16x64xf32>
    %302 = arith.addf %299, %301 : vector<16x64xf32>
    %cst_97 = arith.constant 0.000000e+00 : f32
    %303 = vector.broadcast %cst_97 : f32 to vector<16x64xf32>
    %304 = arith.maximumf %302, %303 : vector<16x64xf32>
    %c0_98 = arith.constant 0 : index
    %c0_99 = arith.constant 0 : index
    %305 = vector.load %arg5[%c0_98, %c0_99] : memref<64x32xf32, #tpu.memory_space<vmem>>, vector<64x32xf32>
    %cst_100 = arith.constant dense<0.000000e+00> : vector<16x32xf32>
    %306 = tpu.matmul %304, %305, %cst_100 {dimension_numbers = #tpu.dot_dimension_numbers<[1], [0], [0], [1], [0, 0, 1, 1], [], []>} : vector<16x64xf32>, vector<64x32xf32>, vector<16x32xf32> -> vector<16x32xf32>
    %307 = arith.addf %273, %306 : vector<16x32xf32>
    %c12 = arith.constant 12 : index
    %c0_101 = arith.constant 0 : index
    %308 = vector.load %arg6[%c12, %c0_101] : memref<13x96xf32, #tpu.memory_space<vmem>>, vector<1x32xf32>
    %309 = vector.broadcast %308 : vector<1x32xf32> to vector<16x32xf32>
    %310 = arith.addf %307, %309 : vector<16x32xf32>
    %311 = vector.shape_cast %310 : vector<16x32xf32> to vector<2x8x32xf32>
    %c0_102 = arith.constant 0 : index
    %c0_103 = arith.constant 0 : index
    %c0_104 = arith.constant 0 : index
    %312 = vector.load %arg7[%c0_102, %c0_103, %c0_104] : memref<2x8x32xf32, #tpu.memory_space<vmem>>, vector<2x8x32xf32>
    tpu.vector_store %arg7[%c0_102, %c0_103, %c0_104], %311 {strides = array<i32>} : memref<2x8x32xf32, #tpu.memory_space<vmem>>, vector<2x8x32xf32>,
    return
  }
}

</mosaic_0001>

<bundles_post_ra>
// kernel: tpu_custom_call.1
= control target key start
LH: loop header
LB: loop body
LE: loop exit
PB: predicated region body
PF: predicated region fallthrough
CT: control target
= control target key end

     0   :  { %12 = vsyncpa [#allocation3], 0  ;;  %s2629_s0 = inlined_call_operand.vmem [shape: f32[2,8,32], index: 0, kind: input, shape index: {}]   ;;  %s2630_s1 = inlined_call_operand.vmem [shape: f32[2,8,32], index: 1, kind: input, shape index: {}]   ;;  %s2631_s2 = inlined_call_operand.vmem [shape: f32[2,8,8], index: 2, kind: input, shape index: {}]   ;;  %s2632_s3 = inlined_call_operand.vmem [shape: f32[2,8,8], index: 3, kind: input, shape index: {}]   ;;  %s2633_s4 = inlined_call_operand.hbm [shape: f32[32,768], index: 4, kind: input, shape index: {}]   ;;  %s2634_s5 = inlined_call_operand.vmem [shape: f32[64,32], index: 5, kind: input, shape index: {}]   ;;  %s2635_s6 = inlined_call_operand.vmem [shape: f32[13,96], index: 6, kind: input, shape index: {}]   ;;  %s2636_s7 = inlined_call_operand.hbm [shape: f32[2,8,32], index: 7, kind: output, shape index: {}]  }
   0x1   :  { %13 = vsyncpa [#allocation4], 0  ;;  %s26_s26 = sshll.u32 %s2633_s4, 4  ;;  %s2092_s27 = smov [#allocation2]   ;;  %s27_s26 = int_to_ptr.hbm [resolvable:$true] %s26_s26 }
   0x2   :  { %s28_s28 = sshll.u32 %s2092_s27, 4  ;;  %s2093_s29 = smov 768   ;;  %s29_s28 = int_to_ptr.vmem [resolvable:$true] %s28_s28 }
   0x3   :  { %s2094_s30 = smov 48  }
   0x4   :  { %34 = dma.hbm_to_vmem [thread:$0]  %s27_s26, 3072, %s29_s28, [#allocation3], %s2093_s29, %s2093_s29, %s2094_s30  }
   0x5   :  { %2088 = dma.done.wait [#allocation3], 3072  }
   0x6   :  { %2089 = vsyncadd [#allocation3], 4294964224  ;;  %vm61_vm0 = vcmask 261120   ;;  %v2159_v0 = vld [vmem:[%s2629_s0 + $0x8] sm:$0xff]  ;;  %v2164_v1 = vld [vmem:[%s2629_s0] sm:$0xff]  ;;  %v2095_v8 = vmov 32.0  }
   0x7   :  { %v65_v2 = vsel %vm61_vm0, %v2159_v0, 0.0  ;;  %v62_v3 = vsel %vm61_vm0, %v2164_v1, 0.0  ;;  %v78_v4 = vmul.f32 %v2159_v0, %v2159_v0  ;;  %v77_v5 = vmul.f32 %v2164_v1, %v2164_v1  ;;  %v126_v14 = vld [vmem:[#allocation2 + $0x90] sm:$0xff]  ;;  %v125_v15 = vld [vmem:[#allocation2 + $0x60] sm:$0xff]  ;;  %s2096_s16 = smov 96   ;;  %s2097_s17 = smov 120  }
   0x8   :  { %66 = vadd.xlane.f32.xlu1 %v65_v2  ;;  %63 = vadd.xlane.f32.xlu0 %v62_v3  ;;  %1962 = vrcp.f32 %v2095_v8  ;;  %v124_v18 = vld [vmem:[#allocation2 + $0x30] sm:$0xff]  ;;  %v123_v21 = vld [vmem:[#allocation2] sm:$0xff]  ;;  %s2098_s18 = smov 88   ;;  %s2099_s19 = smov 104   ;;  %vm161_vm8 = vcmask 64512  }
   0x9   :  { %v82_v6 = vsel %vm61_vm0, %v78_v4, 0.0  ;;  %v79_v7 = vsel %vm61_vm0, %v77_v5, 0.0  ;;  %147 = vmatpush.msra.mxu0 %v126_v14  ;;  %v1949_v46 = vld [vmem:[%s2635_s6] ss:$0 sm:$0xff]  ;;  %v1950_v49 = vld [vmem:[%s2635_s6 + $0x1] ss:$0 sm:$0xff] }
   0xa   :  { %v1951_v57 = vld [vmem:[%s2635_s6 + $0x6] ss:$0 sm:$0xff]  ;;  %s2100_s20 = smov 112   ;;  %s2101_s21 = smov 72  }
   0xb   :  { %148 = vmatpush.msra.mxu0 %v125_v15  ;;  %s2102_s22 = smov 80   ;;  %v47_v14 = vld [vmem:[%s2631_s2] sm:$0xff]  ;;  %s2105_s27 = smov 40  }
   0xc   :  { %vm49_vm9 = vcmp.gt.f32.partialorder %v47_v14, 0.0  ;;  %s2106_s28 = smov 56   ;;  %s2107_s29 = smov 8  }
   0xd   :  { %149 = vmatpush.msra.mxu0 %v124_v18  ;;  %s2109_s8 = smov 24  }
   0xe   :  { %v1963_v9 = vpop.eup %1962 }
   0xf   :  { %v69_v10 = vmul.f32 32.0, %v1963_v9  ;;  %vm73_vm1 = vweird.f32 %v1963_v9  ;;  %150 = vmatpush.msra.mxu0 %v123_v21  ;;  %v48_v21 = vld [vmem:[%s2631_s2 + $0x8] sm:$0xff]  ;;  %s2104_s2 = smov 64  }
  0x10   :  { %83 = vadd.xlane.f32.xlu1 %v82_v6  ;;  %80 = vadd.xlane.f32.xlu0 %v79_v7  ;;  %vm50_vm10 = vcmp.gt.f32.partialorder %v48_v21, 0.0 }
  0x11   :  { %v70_v11 = vsub.f32 1.0, %v69_v10 }
  0x13   :  { %v71_v12 = vmul.f32 %v1963_v9, %v70_v11 }
  0x15   :  { %v72_v13 = vadd.f32 %v1963_v9, %v71_v12 }
  0x17   :  { %v2176_v19 = vsel %vm73_vm1, %v1963_v9, %v72_v13 }
  0x7b   :  { %v67_v16 = vpop.xlane.xlu1 %66  ;;  %v64_v17 = vpop.xlane.xlu0 %63 }
  0x7c   :  { %v76_v20 = vmul.f32 %v2176_v19, %v67_v16  ;;  %v75_v22 = vmul.f32 %v2176_v19, %v64_v17  ;;  %v2103_v16 = vmov -1e+09  }
  0x7d   :  { %v51_v17 = vsel %vm49_vm9, 0.0, %v2103_v16 }
  0x7e   :  { %v88_v23 = vmul.f32 %v76_v20, %v76_v20  ;;  %v87_v26 = vmul.f32 %v75_v22, %v75_v22  ;;  %v91_v45 = vsub.f32 %v2164_v1, %v75_v22  ;;  %v92_v51 = vsub.f32 %v2159_v0, %v76_v20 }
  0x83   :  { %v84_v24 = vpop.xlane.xlu1 %83  ;;  %v81_v25 = vpop.xlane.xlu0 %80 }
  0x84   :  { %v86_v27 = vmul.f32 %v84_v24, %v2176_v19  ;;  %v85_v28 = vmul.f32 %v81_v25, %v2176_v19  ;;  %v52_v24 = vsel %vm50_vm10, 0.0, %v2103_v16 }
  0x86   :  { %v90_v29 = vsub.f32 %v86_v27, %v88_v23  ;;  %v89_v30 = vsub.f32 %v85_v28, %v87_v26 }
  0x88   :  { %v94_v31 = vadd.f32 1e-05, %v90_v29  ;;  %v93_v32 = vadd.f32 1e-05, %v89_v30 }
  0x8a   :  { %1964 = vrsqrt.f32 %v94_v31  ;;  %vm101_vm4 = vweird.f32 %v93_v32  ;;  %vm111_vm6 = vweird.f32 %v94_v31 }
  0x8b   :  { %1966 = vrsqrt.f32 %v93_v32 }
  0x90   :  { %v1965_v33 = vpop.eup %1964 }
  0x91   :  { %v1967_v34 = vpop.eup %1966  ;;  %v106_v35 = vmul.f32 %v1965_v33, %v94_v31  ;;  %vm112_vm3 = vweird.f32 %v1965_v33 }
  0x92   :  { %v96_v36 = vmul.f32 %v1967_v34, %v93_v32  ;;  %vm102_vm2 = vweird.f32 %v1967_v34  ;;  %vm113_vm7 = vmor %vm111_vm6, %vm112_vm3 }
  0x93   :  { %v107_v37 = vmul.f32 %v1965_v33, %v106_v35  ;;  %vm103_vm5 = vmor %vm101_vm4, %vm102_vm2 }
  0x94   :  { %v97_v38 = vmul.f32 %v1967_v34, %v96_v36 }
  0x95   :  { %v108_v39 = vmul.f32 0.5, %v107_v37 }
  0x96   :  { %v98_v40 = vmul.f32 0.5, %v97_v38 }
  0x97   :  { %v109_v41 = vsub.f32 1.5, %v108_v39 }
  0x98   :  { %v99_v42 = vsub.f32 1.5, %v98_v40 }
  0x99   :  { %v110_v43 = vmul.f32 %v1965_v33, %v109_v41 }
  0x9a   :  { %v100_v44 = vmul.f32 %v1967_v34, %v99_v42 }
  0x9b   :  { %v114_v50 = vsel %vm113_vm7, %v1965_v33, %v110_v43 }
  0x9c   :  { %v104_v47 = vsel %vm103_vm5, %v1967_v34, %v100_v44  ;;  %v116_v54 = vmul.f32 %v114_v50, %v92_v51 }
  0x9d   :  { %v115_v48 = vmul.f32 %v104_v47, %v91_v45 }
  0x9e   :  { %v119_v55 = vmul.f32 %v1949_v46, %v116_v54 }
  0x9f   :  { %v118_v52 = vmul.f32 %v1949_v46, %v115_v48 }
  0xa0   :  { %v122_v56 = vadd.f32 %v1950_v49, %v119_v55 }
  0xa1   :  { %v121_v53 = vadd.f32 %v1950_v49, %v118_v52 }
  0xa3   :  { %1857 = vmatmul.msk.f32.vlgmr.msra.gmra.mxu0 %vm61_vm0, %v121_v53 }
  0xab   :  { %1858 = vmatmul.msk.f32.gmra.mxu0 %vm61_vm0, %v122_v56 }
 0x120   :  { %v152_v58 = vpop.f32.mrf.mxu0 }
 0x121   :  { %v2195_v59 = vadd.f32 %v1951_v57, %v152_v58 }
 0x123   :  { %159 = vrot.lane.b32.xlu2 %v2195_v59, %s2096_s16 }
 0x128   :  { %v155_v60 = vpop.f32.mrf.mxu0 }
 0x129   :  { %v2199_v61 = vadd.f32 %v1951_v57, %v155_v60 }
 0x12b   :  { %345 = vrot.lane.b32.xlu1 %v2199_v61, %s2097_s17  ;;  %347 = vrot.lane.b32.xlu0 %v2199_v61, %s2098_s18  ;;  %v1939_v52 = vpack.i.bf16 %v2199_v61, %v2195_v59 }
 0x12c   :  { %187 = vrot.lane.b32.xlu2 %v2199_v61, %s2096_s16 }
 0x133   :  { %637 = vrot.lane.b32.xlu1 %v2195_v59, %s2099_s19  ;;  %477 = vrot.lane.b32.xlu0 %v2195_v59, %s2100_s20 }
 0x134   :  { %319 = vrot.lane.b32.xlu2 %v2195_v59, %s2098_s18 }
 0x13b   :  { %667 = vrot.lane.b32.xlu1 %v2199_v61, %s2101_s21  ;;  %507 = vrot.lane.b32.xlu0 %v2199_v61, %s2102_s22 }
 0x13c   :  { %479 = vrot.lane.b32.xlu2 %v2195_v59, %s2102_s22 }
 0x143   :  { %665 = vrot.lane.b32.xlu0 %v2199_v61, %s2099_s19 }
 0x144   :  { %317 = vrot.lane.b32.xlu2 %v2195_v59, %s2097_s17 }
 0x14c   :  { %639 = vrot.lane.b32.xlu2 %v2195_v59, %s2101_s21 }
 0x154   :  { %505 = vrot.lane.b32.xlu2 %v2199_v61, %s2100_s20 }
 0x17d   :  { %v160_v62 = vpop.permute.xlu2 %159 }
 0x17e   :  { %1859 = vmatpush.xpose.msk.msra.mxu1 %vm161_vm8, %v160_v62 }
 0x181   :  { %1860 = vmatmul.msk.f32.vlgmr.msra.gmra.mxu1 %vm161_vm8, %v2195_v59 }
 0x186   :  { %v188_v63 = vpop.permute.xlu2 %187 }
 0x187   :  { %1861 = vmatpush.xpose.msk.msrb.mxu0 %vm161_vm8, %v188_v63 }
 0x18a   :  { %1862 = vmatmul.msk.f32.vlgmr.msrb.gmra.mxu0 %vm161_vm8, %v2199_v61 }
 0x18e   :  { %v320_v2 = vpop.permute.xlu2 %319 }
 0x18f   :  { %1865 = vmatpush.xpose.msk.msrb.mxu1 %vm161_vm8, %v320_v2 }
 0x196   :  { %v480_v3 = vpop.permute.xlu2 %479 }
 0x19d   :  { %v346_v4 = vpop.permute.xlu1 %345  ;;  %v348_v5 = vpop.permute.xlu0 %347 }
 0x19e   :  { %v318_v6 = vpop.permute.xlu2 %317  ;;  %1867 = vmatpush.xpose.msk.msra.mxu2 %vm161_vm8, %v348_v5 }
 0x19f   :  { %1866 = vmatmul.msk.f32.vlgmr.msrb.gmra.mxu1 %vm161_vm8, %v318_v6 }
 0x1a1   :  { %1868 = vmatmul.msk.f32.vlgmr.msra.gmra.mxu2 %vm161_vm8, %v346_v4 }
 0x1a2   :  { %1871 = vmatpush.xpose.msk.msrb.mxu2 %vm161_vm8, %v480_v3 }
 0x1a5   :  { %v638_v7 = vpop.permute.xlu1 %637  ;;  %v478_v8 = vpop.permute.xlu0 %477 }
 0x1a6   :  { %v640_v9 = vpop.permute.xlu2 %639 }
 0x1a7   :  { %1877 = vmatpush.xpose.msk.msra.mxu2 %vm161_vm8, %v640_v9 }
 0x1a9   :  { %1872 = vmatmul.msk.f32.vlgmr.msrb.gmra.mxu2 %vm161_vm8, %v478_v8 }
 0x1ad   :  { %v668_v10 = vpop.permute.xlu1 %667  ;;  %v508_v11 = vpop.permute.xlu0 %507 }
 0x1ae   :  { %1873 = vmatpush.xpose.msk.msra.mxu0 %vm161_vm8, %v508_v11  ;;  %v506_v12 = vpop.permute.xlu2 %505 }
 0x1b1   :  { %1874 = vmatmul.msk.f32.vlgmr.msra.gmra.mxu0 %vm161_vm8, %v506_v12  ;;  %1878 = vmatmul.msk.f32.vlgmr.msra.gmra.mxu2 %vm161_vm8, %v638_v7 }
 0x1b2   :  { %1879 = vmatpush.xpose.msk.msrb.mxu0 %vm161_vm8, %v668_v10 }
 0x1b5   :  { %v666_v13 = vpop.permute.xlu0 %665 }
 0x1b9   :  { %1880 = vmatmul.msk.f32.vlgmr.msrb.gmra.mxu0 %vm161_vm8, %v666_v13 }
 0x1fe   :  { %v183_v15 = vpop.f32.mrf.mxu1 }
 0x1ff   :  { %v213_v18 = vmul.f32 0.35355338, %v183_v15 }
 0x201   :  { %v215_v20 = vadd.f32 %v213_v18, %v51_v17 }
 0x203   :  { %v217_v22 = vsel %vm161_vm8, %v215_v20, -inf }
 0x204   :  { %218 = vmax.xlane.f32.xlu2 %v217_v22 }
 0x207   :  { %v210_v23 = vpop.f32.mrf.mxu0 }
 0x208   :  { %v214_v25 = vmul.f32 0.35355338, %v210_v23 }
 0x20a   :  { %v216_v26 = vadd.f32 %v214_v25, %v52_v24 }
 0x20c   :  { %v220_v27 = vsel %vm161_vm8, %v216_v26, -inf }
 0x20d   :  { %221 = vmax.xlane.f32.xlu1 %v220_v27 }
 0x21c   :  { %v342_v28 = vpop.f32.mrf.mxu1 }
 0x21d   :  { %v373_v29 = vmul.f32 0.35355338, %v342_v28 }
 0x21f   :  { %v375_v30 = vadd.f32 %v373_v29, %v51_v17 }
 0x221   :  { %v377_v31 = vsel %vm161_vm8, %v375_v30, -inf }
 0x222   :  { %378 = vmax.xlane.f32.xlu0 %v377_v31 }
 0x224   :  { %v370_v32 = vpop.f32.mrf.mxu2 }
 0x225   :  { %v374_v33 = vmul.f32 0.35355338, %v370_v32 }
 0x227   :  { %v376_v34 = vadd.f32 %v374_v33, %v52_v24 }
 0x229   :  { %v380_v35 = vsel %vm161_vm8, %v376_v34, -inf }
 0x22a   :  { %381 = vmax.xlane.f32.xlu0 %v380_v35 }
 0x22c   :  { %v502_v36 = vpop.f32.mrf.mxu2 }
 0x22d   :  { %v533_v37 = vmul.f32 0.35355338, %v502_v36 }
 0x22e   :  { %v530_v38 = vpop.f32.mrf.mxu0 }
 0x22f   :  { %v2257_v39 = vadd.f32 %v533_v37, %v51_v17  ;;  %v534_v40 = vmul.f32 0.35355338, %v530_v38 }
 0x231   :  { %v537_v41 = vsel %vm161_vm8, %v2257_v39, -inf  ;;  %v536_v44 = vadd.f32 %v534_v40, %v52_v24 }
 0x232   :  { %538 = vmax.xlane.f32.xlu2 %v537_v41 }
 0x233   :  { %v540_v49 = vsel %vm161_vm8, %v536_v44, -inf }
 0x234   :  { %v662_v42 = vpop.f32.mrf.mxu2 }
 0x235   :  { %v693_v43 = vmul.f32 0.35355338, %v662_v42 }
 0x236   :  { %v690_v45 = vpop.f32.mrf.mxu0 }
 0x237   :  { %v694_v46 = vmul.f32 0.35355338, %v690_v45  ;;  %v695_v47 = vadd.f32 %v693_v43, %v51_v17 }
 0x239   :  { %v697_v48 = vsel %vm161_vm8, %v695_v47, -inf  ;;  %v696_v50 = vadd.f32 %v694_v46, %v52_v24 }
 0x23a   :  { %698 = vmax.xlane.f32.xlu1 %v697_v48  ;;  %541 = vmax.xlane.f32.xlu2 %v540_v49 }
 0x23b   :  { %v700_v51 = vsel %vm161_vm8, %v696_v50, -inf }
 0x23c   :  { %701 = vmax.xlane.f32.xlu0 %v700_v51 }
 0x250   :  { %1940 = vrot.lane.b32.xlu0 %v1939_v52, %s2104_s2 }
 0x258   :  { %585 = vrot.lane.b32.xlu0 %v2195_v59, %s2094_s30 }
 0x260   :  { %745 = vrot.lane.b32.xlu0 %v2195_v59, %s2105_s27 }
 0x268   :  { %611 = vrot.lane.b32.xlu0 %v2199_v61, %s2094_s30  ;;  %s2108_s30 = smov 16  }
 0x277   :  { %v219_v53 = vpop.xlane.xlu2 %218 }
 0x278   :  { %v223_v54 = vsub.f32 %v215_v20, %v219_v53 }
 0x27a   :  { %v225_v55 = vmul.f32 1.442695, %v223_v54 }
 0x27c   :  { %1968 = vpow2.f32 %v225_v55 }
 0x280   :  { %v222_v56 = vpop.xlane.xlu1 %221 }
 0x281   :  { %v224_v57 = vsub.f32 %v216_v26, %v222_v56 }
 0x282   :  { %v2272_v58 = vpop.eup %1968 }
 0x283   :  { %v227_v60 = vmul.f32 1.442695, %v224_v57  ;;  %v229_v62 = vsel %vm161_vm8, %v2272_v58, 0.0 }
 0x284   :  { %230 = vadd.xlane.f32.xlu1 %v229_v62 }
 0x285   :  { %1970 = vpow2.f32 %v227_v60 }
 0x28b   :  { %v2276_v63 = vpop.eup %1970 }
 0x28c   :  { %v232_v2 = vsel %vm161_vm8, %v2276_v63, 0.0 }
 0x28d   :  { %233 = vadd.xlane.f32.xlu2 %v232_v2 }
 0x295   :  { %v379_v3 = vpop.xlane.xlu0 %378 }
 0x296   :  { %v383_v4 = vsub.f32 %v375_v30, %v379_v3 }
 0x298   :  { %v385_v5 = vmul.f32 1.442695, %v383_v4 }
 0x29a   :  { %1972 = vpow2.f32 %v385_v5 }
 0x29d   :  { %v382_v6 = vpop.xlane.xlu0 %381 }
 0x29e   :  { %v384_v7 = vsub.f32 %v376_v34, %v382_v6 }
 0x2a0   :  { %v2280_v8 = vpop.eup %1972  ;;  %v387_v9 = vmul.f32 1.442695, %v384_v7 }
 0x2a1   :  { %v389_v10 = vsel %vm161_vm8, %v2280_v8, 0.0 }
 0x2a2   :  { %1974 = vpow2.f32 %v387_v9  ;;  %390 = vadd.xlane.f32.xlu1 %v389_v10 }
 0x2a5   :  { %425 = vrot.lane.b32.xlu2 %v2195_v59, %s2106_s28  ;;  %v539_v11 = vpop.xlane.xlu2 %538 }
 0x2a6   :  { %v543_v25 = vsub.f32 %v2257_v39, %v539_v11 }
 0x2a8   :  { %v2286_v12 = vpop.eup %1974  ;;  %v545_v28 = vmul.f32 1.442695, %v543_v25 }
 0x2a9   :  { %v392_v13 = vsel %vm161_vm8, %v2286_v12, 0.0 }
 0x2aa   :  { %393 = vadd.xlane.f32.xlu1 %v392_v13 }
 0x2ad   :  { %v542_v14 = vpop.xlane.xlu2 %541  ;;  %v699_v15 = vpop.xlane.xlu1 %698 }
 0x2ae   :  { %v544_v17 = vsub.f32 %v536_v44, %v542_v14  ;;  %v703_v20 = vsub.f32 %v695_v47, %v699_v15 }
 0x2af   :  { %v702_v22 = vpop.xlane.xlu0 %701 }
 0x2b0   :  { %v547_v18 = vmul.f32 1.442695, %v544_v17  ;;  %v705_v21 = vmul.f32 1.442695, %v703_v20  ;;  %v704_v24 = vsub.f32 %v696_v50, %v702_v22 }
 0x2b2   :  { %1976 = vpow2.f32 %v547_v18  ;;  %v707_v26 = vmul.f32 1.442695, %v704_v24 }
 0x2b3   :  { %1978 = vpow2.f32 %v705_v21 }
 0x2b4   :  { %1980 = vpow2.f32 %v707_v26 }
 0x2b5   :  { %1982 = vpow2.f32 %v545_v28 }
 0x2b8   :  { %v2290_v23 = vpop.eup %1976 }
 0x2b9   :  { %v552_v59 = vsel %vm161_vm8, %v2290_v23, 0.0  ;;  %v2295_v27 = vpop.eup %1978 }
 0x2ba   :  { %553 = vadd.xlane.f32.xlu1 %v552_v59  ;;  %v709_v30 = vsel %vm161_vm8, %v2295_v27, 0.0  ;;  %v2299_v33 = vpop.eup %1980 }
 0x2bb   :  { %v2301_v34 = vpop.eup %1982  ;;  %v712_v35 = vsel %vm161_vm8, %v2299_v33, 0.0 }
 0x2bc   :  { %v549_v36 = vsel %vm161_vm8, %v2301_v34, 0.0 }
 0x2c2   :  { %v1941_v29 = vpop.permute.xlu0 %1940  ;;  %710 = vadd.xlane.f32.xlu1 %v709_v30 }
 0x2c3   :  { %v1942_v31 = vunpack.i.l.bf16 %v1941_v29  ;;  %v1943_v32 = vunpack.i.h.bf16 %v1941_v29 }
 0x2c5   :  { %286 = vmatpush.msra.mxu3 %v1942_v31 }
 0x2c7   :  { %312 = vmatpush.msrb.mxu3 %v1943_v32 }
 0x2ca   :  { %713 = vadd.xlane.f32.xlu1 %v712_v35  ;;  %v586_v3 = vpop.permute.xlu0 %585 }
 0x2ce   :  { %550 = vadd.xlane.f32.xlu2 %v549_v36 }
 0x2d2   :  { %v746_v18 = vpop.permute.xlu0 %745 }
 0x2e3   :  { %771 = vrot.lane.b32.xlu1 %v2199_v61, %s2105_s27 }
 0x2e6   :  { %451 = vrot.lane.b32.xlu2 %v2199_v61, %s2106_s28 }
 0x2f7   :  { %v231_v37 = vpop.xlane.xlu1 %230 }
 0x2f8   :  { %1984 = vrcp.f32 %v231_v37  ;;  %v246_v42 = vand.u32 2147483648, %v231_v37  ;;  %v244_v44 = vand.u32 2147483647, %v231_v37  ;;  %vm240_vm12 = vweird.f32 %v231_v37 }
 0x2fa   :  { %v247_v46 = vor.u32 1.1754944e-38, %v246_v42  ;;  %vm245_vm14 = vcmp.eq.f32.partialorder %v244_v44, 8.507059e+37 }
 0x2fe   :  { %v1985_v38 = vpop.eup %1984 }
 0x2ff   :  { %v236_v39 = vmul.f32 %v1985_v38, %v231_v37  ;;  %vm241_vm11 = vweird.f32 %v1985_v38 }
 0x300   :  { %v234_v40 = vpop.xlane.xlu2 %233  ;;  %vm242_vm13 = vmor %vm240_vm12, %vm241_vm11 }
 0x301   :  { %v237_v41 = vsub.f32 1.0, %v236_v39  ;;  %1986 = vrcp.f32 %v234_v40  ;;  %v260_v52 = vand.u32 2147483648, %v234_v40  ;;  %v258_v55 = vand.u32 2147483647, %v234_v40 }
 0x302   :  { %vm254_vm1 = vweird.f32 %v234_v40 }
 0x303   :  { %v238_v43 = vmul.f32 %v1985_v38, %v237_v41  ;;  %v261_v57 = vor.u32 1.1754944e-38, %v260_v52  ;;  %vm259_vm3 = vcmp.eq.f32.partialorder %v258_v55, 8.507059e+37 }
 0x305   :  { %v239_v45 = vadd.f32 %v1985_v38, %v238_v43 }
 0x307   :  { %v1987_v47 = vpop.eup %1986  ;;  %v243_v48 = vsel %vm242_vm13, %v1985_v38, %v239_v45 }
 0x308   :  { %v250_v49 = vmul.f32 %v1987_v47, %v234_v40  ;;  %v248_v61 = vsel %vm245_vm14, %v247_v46, %v243_v48  ;;  %v426_v53 = vpop.permute.xlu2 %425  ;;  %vm255_vm15 = vweird.f32 %v1987_v47 }
 0x309   :  { %v263_v50 = vmul.f32 %v2272_v58, %v248_v61  ;;  %vm256_vm2 = vmor %vm254_vm1, %vm255_vm15 }
 0x30a   :  { %v251_v51 = vsub.f32 1.0, %v250_v49 }
 0x30b   :  { %1863 = vmatmul.msk.f32.vlgmr.msra.gmra.mxu3 %vm161_vm8, %v263_v50 }
 0x30c   :  { %v252_v54 = vmul.f32 %v1987_v47, %v251_v51  ;;  %446 = vmatpush.msra.mxu3 %v426_v53  ;;  %v612_v53 = vpop.permute.xlu0 %611 }
 0x30e   :  { %v253_v56 = vadd.f32 %v1987_v47, %v252_v54 }
 0x310   :  { %v257_v60 = vsel %vm256_vm2, %v1987_v47, %v253_v56 }
 0x311   :  { %v262_v62 = vsel %vm259_vm3, %v261_v57, %v257_v60 }
 0x312   :  { %v264_v2 = vmul.f32 %v2276_v63, %v262_v62 }
 0x314   :  { %1864 = vmatmul.msk.f32.vlgmr.msrb.gmra.mxu3 %vm161_vm8, %v264_v2 }
 0x315   :  { %606 = vmatpush.msrb.mxu3 %v586_v3  ;;  %v391_v58 = vpop.xlane.xlu1 %390 }
 0x316   :  { %1988 = vrcp.f32 %v391_v58  ;;  %v406_v7 = vand.u32 2147483648, %v391_v58  ;;  %v404_v10 = vand.u32 2147483647, %v391_v58  ;;  %vm400_vm5 = vweird.f32 %v391_v58 }
 0x318   :  { %v407_v13 = vor.u32 1.1754944e-38, %v406_v7  ;;  %vm405_vm7 = vcmp.eq.f32.partialorder %v404_v10, 8.507059e+37 }
 0x31c   :  { %v1989_v4 = vpop.eup %1988 }
 0x31d   :  { %v396_v5 = vmul.f32 %v1989_v4, %v391_v58  ;;  %vm401_vm4 = vweird.f32 %v1989_v4  ;;  %v394_v15 = vpop.xlane.xlu1 %393 }
 0x31e   :  { %vm402_vm6 = vmor %vm400_vm5, %vm401_vm4  ;;  %1990 = vrcp.f32 %v394_v15  ;;  %v420_v31 = vand.u32 2147483648, %v394_v15  ;;  %vm414_vm10 = vweird.f32 %v394_v15  ;;  %v418_v32 = vand.u32 2147483647, %v394_v15 }
 0x31f   :  { %v397_v6 = vsub.f32 1.0, %v396_v5 }
 0x320   :  { %v421_v39 = vor.u32 1.1754944e-38, %v420_v31  ;;  %vm419_vm12 = vcmp.eq.f32.partialorder %v418_v32, 8.507059e+37  ;;  %v831_v32 = vld [vmem:[#allocation2 + $0x68] sm:$0xff] }
 0x321   :  { %v398_v9 = vmul.f32 %v1989_v4, %v397_v6 }
 0x323   :  { %v399_v11 = vadd.f32 %v1989_v4, %v398_v9 }
 0x324   :  { %v1991_v21 = vpop.eup %1990 }
 0x325   :  { %v403_v14 = vsel %vm402_vm6, %v1989_v4, %v399_v11  ;;  %v410_v22 = vmul.f32 %v1991_v21, %v394_v15  ;;  %vm415_vm9 = vweird.f32 %v1991_v21 }
 0x326   :  { %v408_v63 = vsel %vm405_vm7, %v407_v13, %v403_v14  ;;  %vm416_vm11 = vmor %vm414_vm10, %vm415_vm9 }
 0x327   :  { %v423_v17 = vmul.f32 %v2280_v8, %v408_v63  ;;  %v411_v59 = vsub.f32 1.0, %v410_v22 }
 0x329   :  { %1869 = vmatmul.msk.f32.vlgmr.msra.gmra.mxu3 %vm161_vm8, %v423_v17  ;;  %v412_v26 = vmul.f32 %v1991_v21, %v411_v59 }
 0x32a   :  { %766 = vmatpush.msra.mxu3 %v746_v18 }
 0x32b   :  { %v413_v8 = vadd.f32 %v1991_v21, %v412_v26 }
 0x32d   :  { %v554_v20 = vpop.xlane.xlu1 %553  ;;  %v417_v37 = vsel %vm416_vm11, %v1991_v21, %v413_v8 }
 0x32e   :  { %1992 = vrcp.f32 %v554_v20  ;;  %v422_v42 = vsel %vm419_vm12, %v421_v39, %v417_v37  ;;  %v578_v46 = vand.u32 2147483647, %v554_v20  ;;  %v580_v47 = vand.u32 2147483648, %v554_v20 }
 0x32f   :  { %vm574_vm14 = vweird.f32 %v554_v20  ;;  %v424_v51 = vmul.f32 %v2286_v12, %v422_v42 }
 0x330   :  { %vm579_vm1 = vcmp.eq.f32.partialorder %v578_v46, 8.507059e+37  ;;  %v581_v57 = vor.u32 1.1754944e-38, %v580_v47 }
 0x334   :  { %v1993_v25 = vpop.eup %1992 }
 0x335   :  { %v2317_v24 = vpop.xlane.xlu1 %710  ;;  %v570_v28 = vmul.f32 %v1993_v25, %v554_v20  ;;  %vm575_vm13 = vweird.f32 %v1993_v25 }
 0x336   :  { %1994 = vrcp.f32 %v2317_v24  ;;  %vm2329_vm15 = vmor %vm574_vm14, %vm575_vm13  ;;  %v726_v13 = vand.u32 2147483648, %v2317_v24  ;;  %vm720_vm11 = vweird.f32 %v2317_v24  ;;  %v724_v63 = vand.u32 2147483647, %v2317_v24 }
 0x337   :  { %v571_v30 = vsub.f32 1.0, %v570_v28 }
 0x338   :  { %vm725_vm14 = vcmp.eq.f32.partialorder %v724_v63, 8.507059e+37  ;;  %v46_v63 = vld [vmem:[%s2630_s1 + $0x8] sm:$0xff] }
 0x339   :  { %v572_v38 = vmul.f32 %v1993_v25, %v571_v30 }
 0x33b   :  { %v573_v44 = vadd.f32 %v1993_v25, %v572_v38 }
 0x33c   :  { %v2323_v36 = vpop.eup %1994 }
 0x33d   :  { %v2320_v29 = vpop.xlane.xlu1 %713  ;;  %v716_v41 = vmul.f32 %v2323_v36, %v2317_v24  ;;  %v577_v54 = vsel %vm2329_vm15, %v1993_v25, %v573_v44  ;;  %vm721_vm3 = vweird.f32 %v2323_v36  ;;  %vm823_vm15 = vcmask 130048  }
 0x33e   :  { %1996 = vrcp.f32 %v2320_v29  ;;  %v582_v3 = vsel %vm579_vm1, %v581_v57, %v577_v54  ;;  %vm734_vm6 = vweird.f32 %v2320_v29  ;;  %v738_v5 = vand.u32 2147483647, %v2320_v29  ;;  %vm722_vm12 = vmor %vm720_vm11, %vm721_vm3 }
 0x33f   :  { %v717_v49 = vsub.f32 1.0, %v716_v41  ;;  %v740_v6 = vand.u32 2147483648, %v2320_v29  ;;  %v584_v11 = vmul.f32 %v2290_v23, %v582_v3  ;;  %v727_v23 = vor.u32 1.1754944e-38, %v726_v13  ;;  %v960_v3 = vld [vmem:[#allocation2 + $0x48] sm:$0xff] }
 0x340   :  { %vm739_vm13 = vcmp.eq.f32.partialorder %v738_v5, 8.507059e+37  ;;  %vm826_vm1 = vcmask 195584   ;;  %v926_v5 = vld [vmem:[#allocation2 + $0x70] sm:$0xff] }
 0x341   :  { %v551_v35 = vpop.xlane.xlu2 %550  ;;  %v718_v62 = vmul.f32 %v2323_v36, %v717_v49  ;;  %v741_v18 = vor.u32 1.1754944e-38, %v740_v6  ;;  %v1952_v49 = vld [vmem:[%s2635_s6 + $0x7] ss:$0 sm:$0xff] }
 0x342   :  { %1998 = vrcp.f32 %v551_v35  ;;  %v566_v60 = vand.u32 2147483648, %v551_v35  ;;  %v564_v2 = vand.u32 2147483647, %v551_v35  ;;  %vm560_vm5 = vweird.f32 %v551_v35  ;;  %v925_v6 = vld [vmem:[#allocation2 + $0x40] sm:$0xff] }
 0x343   :  { %v719_v9 = vadd.f32 %v2323_v36, %v718_v62 }
 0x344   :  { %v1997_v40 = vpop.eup %1996  ;;  %v567_v7 = vor.u32 1.1754944e-38, %v566_v60  ;;  %vm565_vm9 = vcmp.eq.f32.partialorder %v564_v2, 8.507059e+37  ;;  %v961_v2 = vld [vmem:[#allocation2 + $0x78] sm:$0xff] }
 0x345   :  { %v730_v43 = vmul.f32 %v1997_v40, %v2320_v29  ;;  %vm735_vm4 = vweird.f32 %v1997_v40  ;;  %v723_v20 = vsel %vm722_vm12, %v2323_v36, %v719_v9  ;;  %v829_v36 = vld [vmem:[#allocation2 + $0x8] sm:$0xff]  ;;  %v924_v9 = vld [vmem:[#allocation2 + $0x10] sm:$0xff] }
 0x346   :  { %vm736_vm10 = vmor %vm734_vm6, %vm735_vm4  ;;  %v728_v24 = vsel %vm725_vm14, %v727_v23, %v723_v20 }
 0x347   :  { %v731_v48 = vsub.f32 1.0, %v730_v43 }
 0x348   :  { %v1999_v45 = vpop.eup %1998 }
 0x349   :  { %v556_v61 = vmul.f32 %v1999_v45, %v551_v35  ;;  %v452_v50 = vpop.permute.xlu2 %451  ;;  %v732_v55 = vmul.f32 %v1997_v40, %v731_v48  ;;  %vm561_vm2 = vweird.f32 %v1999_v45  ;;  %v830_v35 = vld [vmem:[#allocation2 + $0x38] sm:$0xff] }
 0x34a   :  { %472 = vmatpush.msra.mxu1 %v452_v50  ;;  %vm562_vm7 = vmor %vm560_vm5, %vm561_vm2 }
 0x34b   :  { %v557_v56 = vsub.f32 1.0, %v556_v61  ;;  %1870 = vmatmul.msk.f32.vlgmr.msra.gmra.mxu1 %vm161_vm8, %v424_v51  ;;  %v733_v58 = vadd.f32 %v1997_v40, %v732_v55 }
 0x34c   :  { %632 = vmatpush.msrb.mxu1 %v612_v53 }
 0x34d   :  { %v558_v12 = vmul.f32 %v1999_v45, %v557_v56  ;;  %v737_v15 = vsel %vm736_vm10, %v1997_v40, %v733_v58  ;;  %v959_v58 = vld [vmem:[#allocation2 + $0x18] sm:$0xff] }
 0x34e   :  { %v742_v21 = vsel %vm739_vm13, %v741_v18, %v737_v15 }
 0x34f   :  { %v559_v4 = vadd.f32 %v1999_v45, %v558_v12  ;;  %v744_v59 = vmul.f32 %v2299_v33, %v742_v21  ;;  %v832_v33 = vld [vmem:[#allocation2 + $0x98] sm:$0xff]  ;;  %v962_v12 = vld [vmem:[#allocation2 + $0xa8] sm:$0xff] }
 0x350   :  { %851 = vmatpush.msrb.mxu2 %v832_v33 }
 0x351   :  { %v563_v10 = vsel %vm562_vm7, %v1999_v45, %v559_v4  ;;  %v927_v4 = vld [vmem:[#allocation2 + $0xa0] sm:$0xff] }
 0x352   :  { %v568_v14 = vsel %vm565_vm9, %v567_v7, %v563_v10  ;;  %852 = vmatpush.msrb.mxu2 %v831_v32  ;;  %948 = vmatpush.msra.mxu0 %v927_v4  ;;  %v1954_v32 = vld [vmem:[%s2635_s6 + $0x3] ss:$0 sm:$0xff] }
 0x353   :  { %1876 = vmatmul.msk.f32.vlgmr.msrb.gmra.mxu1 %vm161_vm8, %v584_v11  ;;  %v583_v17 = vmul.f32 %v2301_v34, %v568_v14  ;;  %v743_v34 = vmul.f32 %v2295_v27, %v728_v24 }
 0x354   :  { %853 = vmatpush.msrb.mxu2 %v830_v35  ;;  %949 = vmatpush.msra.mxu0 %v926_v5 }
 0x355   :  { %1875 = vmatmul.msk.f32.vlgmr.msrb.gmra.mxu3 %vm161_vm8, %v583_v17  ;;  %v772_v22 = vpop.permute.xlu1 %771 }
 0x356   :  { %792 = vmatpush.msra.mxu1 %v772_v22  ;;  %854 = vmatpush.msrb.mxu2 %v829_v36 }
 0x357   :  { %983 = vmatpush.msrb.mxu3 %v962_v12  ;;  %950 = vmatpush.msra.mxu0 %v925_v6 }
 0x359   :  { %984 = vmatpush.msrb.mxu3 %v961_v2  ;;  %951 = vmatpush.msra.mxu0 %v924_v9 }
 0x35b   :  { %1882 = vmatmul.msk.f32.vlgmr.msra.gmra.mxu1 %vm161_vm8, %v744_v59  ;;  %985 = vmatpush.msrb.mxu3 %v960_v3 }
 0x35d   :  { %1881 = vmatmul.msk.f32.vlgmr.msra.gmra.mxu3 %vm161_vm8, %v743_v34 }
 0x35e   :  { %986 = vmatpush.msrb.mxu3 %v959_v58  ;;  %v53_v58 = vld [vmem:[%s2632_s3] sm:$0xff] }
 0x35f   :  { %vm55_vm9 = vcmp.gt.f32.partialorder %v53_v58, 0.0 }
 0x38e   :  { %v288_v25 = vpop.f32.mrf.mxu3 }
 0x397   :  { %v314_v26 = vpop.f32.mrf.mxu3 }
 0x3ac   :  { %v448_v28 = vpop.f32.mrf.mxu3 }
 0x3ad   :  { %799 = vrot.lane.b32.xlu2 %v448_v28, %s2107_s29 }
 0x3c8   :  { %v474_v29 = vpop.f32.mrf.mxu1 }
 0x3d0   :  { %v634_v30 = vpop.f32.mrf.mxu1 }
 0x3d8   :  { %v608_v8 = vpop.f32.mrf.mxu3  ;;  %v794_v27 = vpop.f32.mrf.mxu1 }
 0x3d9   :  { %807 = vrot.lane.b32.xlu0 %v608_v8, %s2108_s30 }
 0x3e0   :  { %v768_v31 = vpop.f32.mrf.mxu3 }
 0x3e1   :  { %815 = vrot.lane.b32.xlu2 %v768_v31, %s2109_s8  ;;  %801 = vrot.lane.b32.xlu0 %v474_v29, %s2107_s29  ;;  %v1953_v31 = vld [vmem:[%s2635_s6 + $0x2] ss:$0 sm:$0xff] }
 0x3e9   :  { %809 = vrot.lane.b32.xlu2 %v634_v30, %s2108_s30  ;;  %817 = vrot.lane.b32.xlu0 %v794_v27, %s2109_s8 }
 0x407   :  { %v800_v37 = vpop.permute.xlu2 %799 }
 0x408   :  { %v821_v38 = vsel %vm161_vm8, %v288_v25, %v800_v37 }
 0x43b   :  { %v816_v40 = vpop.permute.xlu2 %815 }
 0x443   :  { %v810_v45 = vpop.permute.xlu2 %809 }
 0x44b   :  { %v808_v39 = vpop.permute.xlu0 %807 }
 0x44c   :  { %v824_v41 = vsel %vm823_vm15, %v821_v38, %v808_v39 }
 0x44d   :  { %v827_v42 = vsel %vm826_vm1, %v824_v41, %v816_v40 }
 0x44e   :  { %1883 = vmatmul.msk.f32.vlgmr.msrb.gmra.mxu2 %vm61_vm0, %v827_v42 }
 0x453   :  { %v802_v43 = vpop.permute.xlu0 %801 }
 0x454   :  { %v822_v44 = vsel %vm161_vm8, %v314_v26, %v802_v43 }
 0x455   :  { %v825_v47 = vsel %vm823_vm15, %v822_v44, %v810_v45 }
 0x45b   :  { %v818_v46 = vpop.permute.xlu0 %817 }
 0x45c   :  { %v828_v48 = vsel %vm826_vm1, %v825_v47, %v818_v46 }
 0x45d   :  { %1884 = vmatmul.msk.f32.gmra.mxu2 %vm61_vm0, %v828_v48  ;;  %v1955_v48 = vld [vmem:[%s2635_s6 + $0x9] ss:$0 sm:$0xff] }
 0x4d1   :  { %v856_v61 = vpop.f32.mrf.mxu2 }
 0x4d2   :  { %v862_v50 = vadd.f32 %v856_v61, %v2164_v1 }
 0x4d4   :  { %v2374_v51 = vadd.f32 %v1952_v49, %v862_v50 }
 0x4d6   :  { %v870_v52 = vsel %vm61_vm0, %v2374_v51, 0.0  ;;  %v878_v53 = vmul.f32 %v2374_v51, %v2374_v51 }
 0x4d7   :  { %871 = vadd.xlane.f32.xlu1 %v870_v52 }
 0x4d8   :  { %v880_v54 = vsel %vm61_vm0, %v878_v53, 0.0  ;;  %v1956_v53 = vld [vmem:[%s2635_s6 + $0x8] ss:$0 sm:$0xff] }
 0x4d9   :  { %881 = vadd.xlane.f32.xlu2 %v880_v54 }
 0x4e0   :  { %v859_v55 = vpop.f32.mrf.mxu2 }
 0x4e1   :  { %v863_v56 = vadd.f32 %v859_v55, %v2159_v0  ;;  %v45_v0 = vld [vmem:[%s2630_s1] sm:$0xff] }
 0x4e2   :  { %1887 = vmatmul.msk.f32.vlgmr.msrb.gmra.mxu3 %vm61_vm0, %v45_v0 }
 0x4e3   :  { %v2382_v57 = vadd.f32 %v1952_v49, %v863_v56 }
 0x4e5   :  { %v873_v1 = vsel %vm61_vm0, %v2382_v57, 0.0  ;;  %v879_v60 = vmul.f32 %v2382_v57, %v2382_v57 }
 0x4e6   :  { %874 = vadd.xlane.f32.xlu0 %v873_v1 }
 0x4e7   :  { %v883_v62 = vsel %vm61_vm0, %v879_v60, 0.0 }
 0x4e8   :  { %884 = vadd.xlane.f32.xlu1 %v883_v62 }
 0x4ea   :  { %1888 = vmatmul.msk.f32.gmra.mxu3 %vm61_vm0, %v46_v63 }
 0x54a   :  { %v872_v7 = vpop.xlane.xlu1 %871 }
 0x54b   :  { %v876_v10 = vmul.f32 %v872_v7, %v2176_v19  ;;  %v57_v7 = vsel %vm55_vm9, 0.0, %v2103_v16 }
 0x54c   :  { %v882_v11 = vpop.xlane.xlu2 %881 }
 0x54d   :  { %v888_v13 = vmul.f32 %v876_v10, %v876_v10  ;;  %v886_v14 = vmul.f32 %v882_v11, %v2176_v19  ;;  %v892_v30 = vsub.f32 %v2374_v51, %v876_v10 }
 0x54f   :  { %v890_v15 = vsub.f32 %v886_v14, %v888_v13 }
 0x551   :  { %v894_v17 = vadd.f32 1e-05, %v890_v15  ;;  %v54_v15 = vld [vmem:[%s2632_s3 + $0x8] sm:$0xff]  ;;  %s1844_s3 = sshll.u32 %s2636_s7, 4  ;;  %s1845_s3 = int_to_ptr.hbm [resolvable:$true] %s1844_s3 }
 0x552   :  { %vm56_vm10 = vcmp.gt.f32.partialorder %v54_v15, 0.0 }
 0x553   :  { %2000 = vrsqrt.f32 %v894_v17  ;;  %vm902_vm3 = vweird.f32 %v894_v17 }
 0x559   :  { %v2001_v18 = vpop.eup %2000  ;;  %v875_v20 = vpop.xlane.xlu0 %874 }
 0x55a   :  { %v897_v23 = vmul.f32 %v2001_v18, %v894_v17  ;;  %v877_v21 = vmul.f32 %v875_v20, %v2176_v19  ;;  %vm903_vm2 = vweird.f32 %v2001_v18  ;;  %v58_v20 = vsel %vm56_vm10, 0.0, %v2103_v16 }
 0x55b   :  { %v885_v22 = vpop.xlane.xlu1 %884  ;;  %vm904_vm4 = vmor %vm902_vm3, %vm903_vm2 }
 0x55c   :  { %v898_v24 = vmul.f32 %v2001_v18, %v897_v23  ;;  %v889_v59 = vmul.f32 %v877_v21, %v877_v21  ;;  %v887_v34 = vmul.f32 %v885_v22, %v2176_v19  ;;  %v893_v43 = vsub.f32 %v2382_v57, %v877_v21 }
 0x55e   :  { %v899_v25 = vmul.f32 0.5, %v898_v24  ;;  %v891_v26 = vsub.f32 %v887_v34, %v889_v59 }
 0x560   :  { %v900_v28 = vsub.f32 1.5, %v899_v25  ;;  %v895_v29 = vadd.f32 1e-05, %v891_v26 }
 0x562   :  { %v901_v8 = vmul.f32 %v2001_v18, %v900_v28  ;;  %2002 = vrsqrt.f32 %v895_v29  ;;  %vm912_vm6 = vweird.f32 %v895_v29 }
 0x564   :  { %v905_v27 = vsel %vm904_vm4, %v2001_v18, %v901_v8 }
 0x565   :  { %v916_v33 = vmul.f32 %v905_v27, %v892_v30  ;;  %v988_v49 = vpop.f32.mrf.mxu3 }
 0x566   :  { %v2414_v61 = vadd.f32 %v1955_v48, %v988_v49 }
 0x567   :  { %v919_v35 = vmul.f32 %v1953_v31, %v916_v33 }
 0x568   :  { %v2003_v36 = vpop.eup %2002  ;;  %1312 = vrot.lane.b32.xlu1 %v2414_v61, %s2100_s20  ;;  %1889 = vmatpush.xpose.msk.msrb.mxu1 %vm161_vm8, %v2414_v61 }
 0x569   :  { %v907_v37 = vmul.f32 %v2003_v36, %v895_v29  ;;  %v922_v38 = vadd.f32 %v1954_v32, %v919_v35  ;;  %vm913_vm5 = vweird.f32 %v2003_v36  ;;  %1152 = vrot.lane.b32.xlu2 %v2414_v61, %s2097_s17 }
 0x56a   :  { %vm914_vm7 = vmor %vm912_vm6, %vm913_vm5 }
 0x56b   :  { %v908_v39 = vmul.f32 %v2003_v36, %v907_v37  ;;  %1885 = vmatmul.msk.f32.vlgmr.msra.gmra.mxu0 %vm61_vm0, %v922_v38 }
 0x56d   :  { %v909_v40 = vmul.f32 0.5, %v908_v39  ;;  %v991_v50 = vpop.f32.mrf.mxu3 }
 0x56e   :  { %v2424_v52 = vadd.f32 %v1955_v48, %v991_v50 }
 0x56f   :  { %v910_v41 = vsub.f32 1.5, %v909_v40 }
 0x570   :  { %1891 = vmatpush.xpose.msk.msra.mxu1 %vm161_vm8, %v2424_v52  ;;  %v1944_v60 = vpack.i.bf16 %v2424_v52, %v2414_v61 }
 0x571   :  { %v911_v42 = vmul.f32 %v2003_v36, %v910_v41  ;;  %1472 = vrot.lane.b32.xlu2 %v2414_v61, %s2099_s19 }
 0x573   :  { %v915_v44 = vsel %vm914_vm7, %v2003_v36, %v911_v42 }
 0x574   :  { %v917_v45 = vmul.f32 %v915_v44, %v893_v43 }
 0x576   :  { %v920_v46 = vmul.f32 %v1953_v31, %v917_v45 }
 0x578   :  { %v923_v47 = vadd.f32 %v1954_v32, %v920_v46 }
 0x57a   :  { %1886 = vmatmul.msk.f32.gmra.mxu0 %vm61_vm0, %v923_v47 }
 0x5c3   :  { %v1153_v62 = vpop.permute.xlu2 %1152 }
 0x5c4   :  { %1895 = vmatpush.xpose.msk.msra.mxu3 %vm161_vm8, %v1153_v62 }
 0x5cb   :  { %v1473_v2 = vpop.permute.xlu2 %1472 }
 0x5da   :  { %v1313_v12 = vpop.permute.xlu1 %1312 }
 0x5db   :  { %1901 = vmatpush.xpose.msk.msrb.mxu3 %vm161_vm8, %v1313_v12 }
 0x5e8   :  { %v953_v54 = vpop.f32.mrf.mxu0 }
 0x5e9   :  { %v954_v55 = vadd.f32 %v1956_v53, %v953_v54 }
 0x5eb   :  { %1470 = vrot.lane.b32.xlu1 %v954_v55, %s2099_s19  ;;  %1150 = vrot.lane.b32.xlu0 %v954_v55, %s2097_s17 }
 0x5ec   :  { %1890 = vmatmul.msk.f32.vlgmr.msrb.gmra.mxu1 %vm161_vm8, %v954_v55 }
 0x5f3   :  { %1340 = vrot.lane.b32.xlu1 %v2424_v52, %s2100_s20  ;;  %1310 = vrot.lane.b32.xlu0 %v954_v55, %s2100_s20 }
 0x5f7   :  { %v956_v56 = vpop.f32.mrf.mxu0 }
 0x5f8   :  { %v957_v1 = vadd.f32 %v1956_v53, %v956_v56 }
 0x5fa   :  { %1178 = vrot.lane.b32.xlu2 %v957_v1, %s2097_s17  ;;  %1892 = vmatmul.msk.f32.vlgmr.msra.gmra.mxu1 %vm161_vm8, %v957_v1 }
 0x5fb   :  { %1498 = vrot.lane.b32.xlu1 %v957_v1, %s2099_s19  ;;  %1180 = vrot.lane.b32.xlu0 %v2424_v52, %s2097_s17 }
 0x602   :  { %1500 = vrot.lane.b32.xlu2 %v2424_v52, %s2099_s19 }
 0x603   :  { %1338 = vrot.lane.b32.xlu0 %v957_v1, %s2100_s20 }
 0x60b   :  { %1945 = vrot.lane.b32.xlu0 %v1944_v60, %s2096_s16 }
 0x654   :  { %v1179_v5 = vpop.permute.xlu2 %1178 }
 0x65c   :  { %v1501_v63 = vpop.permute.xlu2 %1500 }
 0x65d   :  { %v1151_v3 = vpop.permute.xlu0 %1150  ;;  %v1471_v0 = vpop.permute.xlu1 %1470 }
 0x65e   :  { %1896 = vmatmul.msk.f32.vlgmr.msra.gmra.mxu3 %vm161_vm8, %v1151_v3 }
 0x65f   :  { %1907 = vmatpush.xpose.msk.msra.mxu3 %vm161_vm8, %v1473_v2 }
 0x665   :  { %v1311_v4 = vpop.permute.xlu0 %1310  ;;  %v1341_v13 = vpop.permute.xlu1 %1340 }
 0x666   :  { %1902 = vmatmul.msk.f32.vlgmr.msrb.gmra.mxu3 %vm161_vm8, %v1311_v4 }
 0x669   :  { %v1017_v6 = vpop.f32.mrf.mxu1 }
 0x66a   :  { %v1046_v9 = vmul.f32 0.35355338, %v1017_v6 }
 0x66c   :  { %v1048_v10 = vadd.f32 %v1046_v9, %v57_v7 }
 0x66d   :  { %v1181_v11 = vpop.permute.xlu0 %1180  ;;  %v1499_v25 = vpop.permute.xlu1 %1498 }
 0x66e   :  { %1897 = vmatpush.xpose.msk.msrb.mxu1 %vm161_vm8, %v1181_v11  ;;  %v1050_v14 = vsel %vm161_vm8, %v1048_v10, -inf  ;;  %1908 = vmatmul.msk.f32.vlgmr.msra.gmra.mxu3 %vm161_vm8, %v1471_v0 }
 0x66f   :  { %1051 = vmax.xlane.f32.xlu0 %v1050_v14 }
 0x671   :  { %1898 = vmatmul.msk.f32.vlgmr.msrb.gmra.mxu1 %vm161_vm8, %v1179_v5 }
 0x672   :  { %1903 = vmatpush.xpose.msk.msra.mxu1 %vm161_vm8, %v1341_v13 }
 0x675   :  { %v1339_v17 = vpop.permute.xlu0 %1338 }
 0x676   :  { %1909 = vmatpush.xpose.msk.msrb.mxu1 %vm161_vm8, %v1501_v63 }
 0x677   :  { %v1043_v18 = vpop.f32.mrf.mxu1 }
 0x678   :  { %v1047_v23 = vmul.f32 0.35355338, %v1043_v18 }
 0x679   :  { %1904 = vmatmul.msk.f32.vlgmr.msra.gmra.mxu1 %vm161_vm8, %v1339_v17 }
 0x67a   :  { %v1049_v21 = vadd.f32 %v1047_v23, %v58_v20 }
 0x67c   :  { %v1053_v22 = vsel %vm161_vm8, %v1049_v21, -inf }
 0x67d   :  { %v1946_v24 = vpop.permute.xlu0 %1945  ;;  %1054 = vmax.xlane.f32.xlu1 %v1053_v22 }
 0x67e   :  { %v1948_v59 = vunpack.i.h.bf16 %v1946_v24  ;;  %v1947_v34 = vunpack.i.l.bf16 %v1946_v24 }
 0x680   :  { %1119 = vmatpush.msra.mxu2 %v1947_v34  ;;  %1145 = vmatpush.msrb.mxu0 %v1948_v59 }
 0x681   :  { %1910 = vmatmul.msk.f32.vlgmr.msrb.gmra.mxu1 %vm161_vm8, %v1499_v25 }
 0x6e1   :  { %v1175_v26 = vpop.f32.mrf.mxu3 }
 0x6e2   :  { %v1052_v28 = vpop.xlane.xlu0 %1051  ;;  %v1206_v29 = vmul.f32 0.35355338, %v1175_v26 }
 0x6e3   :  { %v1056_v8 = vsub.f32 %v1048_v10, %v1052_v28 }
 0x6e4   :  { %v1208_v16 = vadd.f32 %v1206_v29, %v57_v7 }
 0x6e5   :  { %v1058_v30 = vmul.f32 1.442695, %v1056_v8 }
 0x6e6   :  { %v1210_v31 = vsel %vm161_vm8, %v1208_v16, -inf }
 0x6e7   :  { %2004 = vpow2.f32 %v1058_v30  ;;  %1211 = vmax.xlane.f32.xlu2 %v1210_v31 }
 0x6e9   :  { %v1335_v27 = vpop.f32.mrf.mxu3 }
 0x6ea   :  { %v1366_v33 = vmul.f32 0.35355338, %v1335_v27 }
 0x6ec   :  { %v1368_v32 = vadd.f32 %v1366_v33, %v57_v7 }
 0x6ed   :  { %v2471_v35 = vpop.eup %2004 }
 0x6ee   :  { %v1062_v36 = vsel %vm161_vm8, %v2471_v35, 0.0  ;;  %v1203_v37 = vpop.f32.mrf.mxu1  ;;  %v1370_v38 = vsel %vm161_vm8, %v1368_v32, -inf }
 0x6ef   :  { %1063 = vadd.xlane.f32.xlu1 %v1062_v36  ;;  %v1207_v39 = vmul.f32 0.35355338, %v1203_v37  ;;  %1371 = vmax.xlane.f32.xlu0 %v1370_v38 }
 0x6f0   :  { %v1055_v40 = vpop.xlane.xlu1 %1054 }
 0x6f1   :  { %v1057_v41 = vsub.f32 %v1049_v21, %v1055_v40  ;;  %v1495_v42 = vpop.f32.mrf.mxu3  ;;  %v1209_v43 = vadd.f32 %v1207_v39, %v58_v20 }
 0x6f2   :  { %v1526_v44 = vmul.f32 0.35355338, %v1495_v42 }
 0x6f3   :  { %v1060_v45 = vmul.f32 1.442695, %v1057_v41  ;;  %v1213_v46 = vsel %vm161_vm8, %v1209_v43, -inf }
 0x6f4   :  { %1214 = vmax.xlane.f32.xlu2 %v1213_v46  ;;  %v2477_v47 = vadd.f32 %v1526_v44, %v57_v7 }
 0x6f5   :  { %2006 = vpow2.f32 %v1060_v45 }
 0x6f6   :  { %v1363_v48 = vpop.f32.mrf.mxu1  ;;  %v1530_v49 = vsel %vm161_vm8, %v2477_v47, -inf }
 0x6f7   :  { %v1367_v50 = vmul.f32 0.35355338, %v1363_v48  ;;  %1531 = vmax.xlane.f32.xlu1 %v1530_v49 }
 0x6f9   :  { %v1369_v53 = vadd.f32 %v1367_v50, %v58_v20 }
 0x6fb   :  { %v2481_v54 = vpop.eup %2006  ;;  %v1373_v55 = vsel %vm161_vm8, %v1369_v53, -inf }
 0x6fc   :  { %1374 = vmax.xlane.f32.xlu0 %v1373_v55  ;;  %v1065_v56 = vsel %vm161_vm8, %v2481_v54, 0.0 }
 0x6fd   :  { %1066 = vadd.xlane.f32.xlu2 %v1065_v56 }
 0x6fe   :  { %v1523_v1 = vpop.f32.mrf.mxu1 }
 0x6ff   :  { %v1527_v60 = vmul.f32 0.35355338, %v1523_v1 }
 0x701   :  { %v2486_v62 = vadd.f32 %v1527_v60, %v58_v20 }
 0x703   :  { %v1533_v12 = vsel %vm161_vm8, %v2486_v62, -inf }
 0x705   :  { %1534 = vmax.xlane.f32.xlu2 %v1533_v12 }
 0x710   :  { %1418 = vrot.lane.b32.xlu0 %v2414_v61, %s2102_s22 }
 0x71d   :  { %1258 = vrot.lane.b32.xlu2 %v2414_v61, %s2098_s18 }
 0x75a   :  { %v1212_v2 = vpop.xlane.xlu2 %1211 }
 0x75b   :  { %v1216_v3 = vsub.f32 %v1208_v16, %v1212_v2 }
 0x75d   :  { %v1218_v58 = vmul.f32 1.442695, %v1216_v3 }
 0x75f   :  { %2008 = vpow2.f32 %v1218_v58 }
 0x762   :  { %v1064_v0 = vpop.xlane.xlu1 %1063  ;;  %v1372_v4 = vpop.xlane.xlu0 %1371 }
 0x763   :  { %2010 = vrcp.f32 %v1064_v0  ;;  %v1376_v5 = vsub.f32 %v1368_v32, %v1372_v4  ;;  %v1079_v17 = vand.u32 2147483648, %v1064_v0  ;;  %v1077_v23 = vand.u32 2147483647, %v1064_v0 }
 0x764   :  { %vm1073_vm12 = vweird.f32 %v1064_v0 }
 0x765   :  { %v2494_v6 = vpop.eup %2008  ;;  %v1378_v7 = vmul.f32 1.442695, %v1376_v5  ;;  %v1080_v26 = vor.u32 1.1754944e-38, %v1079_v17  ;;  %vm1078_vm14 = vcmp.eq.f32.partialorder %v1077_v23, 8.507059e+37 }
 0x766   :  { %v1222_v9 = vsel %vm161_vm8, %v2494_v6, 0.0 }
 0x767   :  { %1223 = vadd.xlane.f32.xlu0 %v1222_v9  ;;  %v1215_v10 = vpop.xlane.xlu2 %1214  ;;  %2012 = vpow2.f32 %v1378_v7 }
 0x768   :  { %v1217_v11 = vsub.f32 %v1209_v43, %v1215_v10 }
 0x769   :  { %v2011_v13 = vpop.eup %2010 }
 0x76a   :  { %v1069_v14 = vmul.f32 %v2011_v13, %v1064_v0  ;;  %v1220_v63 = vmul.f32 1.442695, %v1217_v11  ;;  %vm1074_vm11 = vweird.f32 %v2011_v13  ;;  %v1532_v21 = vpop.xlane.xlu1 %1531 }
 0x76b   :  { %vm1075_vm13 = vmor %vm1073_vm12, %vm1074_vm11  ;;  %v1536_v8 = vsub.f32 %v2477_v47, %v1532_v21 }
 0x76c   :  { %v1070_v15 = vsub.f32 1.0, %v1069_v14  ;;  %2014 = vpow2.f32 %v1220_v63 }
 0x76d   :  { %v2498_v18 = vpop.eup %2012  ;;  %v1538_v33 = vmul.f32 1.442695, %v1536_v8 }
 0x76e   :  { %v1071_v20 = vmul.f32 %v2011_v13, %v1070_v15  ;;  %v1382_v22 = vsel %vm161_vm8, %v2498_v18, 0.0 }
 0x76f   :  { %v1375_v24 = vpop.xlane.xlu0 %1374  ;;  %1383 = vadd.xlane.f32.xlu1 %v1382_v22 }
 0x770   :  { %v1072_v59 = vadd.f32 %v2011_v13, %v1071_v20  ;;  %v1377_v34 = vsub.f32 %v1369_v53, %v1375_v24  ;;  %v1067_v25 = vpop.xlane.xlu2 %1066 }
 0x771   :  { %2016 = vrcp.f32 %v1067_v25  ;;  %v1093_v41 = vand.u32 2147483648, %v1067_v25  ;;  %v1091_v43 = vand.u32 2147483647, %v1067_v25  ;;  %vm1087_vm3 = vweird.f32 %v1067_v25 }
 0x772   :  { %v2502_v28 = vpop.eup %2014  ;;  %v1076_v29 = vsel %vm1075_vm13, %v2011_v13, %v1072_v59  ;;  %v1380_v16 = vmul.f32 1.442695, %v1377_v34 }
 0x773   :  { %v1081_v30 = vsel %vm1078_vm14, %v1080_v26, %v1076_v29  ;;  %v1225_v31 = vsel %vm161_vm8, %v2502_v28, 0.0  ;;  %v1094_v46 = vor.u32 1.1754944e-38, %v1093_v41  ;;  %vm1092_vm5 = vcmp.eq.f32.partialorder %v1091_v43, 8.507059e+37 }
 0x774   :  { %2018 = vpow2.f32 %v1380_v16  ;;  %1226 = vadd.xlane.f32.xlu2 %v1225_v31  ;;  %v1096_v27 = vmul.f32 %v2471_v35, %v1081_v30 }
 0x775   :  { %2020 = vpow2.f32 %v1538_v33 }
 0x776   :  { %1893 = vmatmul.msk.f32.vlgmr.msra.gmra.mxu2 %vm161_vm8, %v1096_v27 }
 0x777   :  { %v2017_v32 = vpop.eup %2016 }
 0x778   :  { %v1083_v36 = vmul.f32 %v2017_v32, %v1067_v25  ;;  %v1535_v37 = vpop.xlane.xlu2 %1534  ;;  %vm1088_vm2 = vweird.f32 %v2017_v32 }
 0x779   :  { %v1537_v40 = vsub.f32 %v2486_v62, %v1535_v37  ;;  %vm1089_vm4 = vmor %vm1087_vm3, %vm1088_vm2 }
 0x77a   :  { %v2509_v38 = vpop.eup %2018  ;;  %v1084_v39 = vsub.f32 1.0, %v1083_v36 }
 0x77b   :  { %1284 = vrot.lane.b32.xlu0 %v2424_v52, %s2098_s18  ;;  %v1385_v42 = vsel %vm161_vm8, %v2509_v38, 0.0  ;;  %v1540_v45 = vmul.f32 1.442695, %v1537_v40  ;;  %v2516_v47 = vpop.eup %2020  ;;  %s2110_s18 = smov [#allocation5]  }
 0x77c   :  { %v1085_v35 = vmul.f32 %v2017_v32, %v1084_v39  ;;  %1386 = vadd.xlane.f32.xlu1 %v1385_v42  ;;  %v1542_v56 = vsel %vm161_vm8, %v2516_v47, 0.0 }
 0x77d   :  { %2022 = vpow2.f32 %v1540_v45 }
 0x77e   :  { %v1086_v44 = vadd.f32 %v2017_v32, %v1085_v35 }
 0x780   :  { %v1090_v48 = vsel %vm1089_vm4, %v2017_v32, %v1086_v44  ;;  %v1259_v49 = vpop.permute.xlu2 %1258 }
 0x781   :  { %v1095_v50 = vsel %vm1092_vm5, %v1094_v46, %v1090_v48  ;;  %1279 = vmatpush.msrb.mxu2 %v1259_v49 }
 0x782   :  { %v1419_v53 = vpop.permute.xlu0 %1418  ;;  %v1097_v55 = vmul.f32 %v2481_v54, %v1095_v50 }
 0x783   :  { %1604 = vrot.lane.b32.xlu0 %v2424_v52, %s2101_s21  ;;  %1439 = vmatpush.msra.mxu2 %v1419_v53  ;;  %v2524_v1 = vpop.eup %2022 }
 0x784   :  { %1543 = vadd.xlane.f32.xlu1 %v1542_v56  ;;  %1894 = vmatmul.msk.f32.vlgmr.msrb.gmra.mxu0 %vm161_vm8, %v1097_v55  ;;  %v1545_v60 = vsel %vm161_vm8, %v2524_v1, 0.0 }
 0x78c   :  { %1444 = vrot.lane.b32.xlu2 %v2424_v52, %s2102_s22  ;;  %1546 = vadd.xlane.f32.xlu1 %v1545_v60 }
 0x7a5   :  { %1578 = vrot.lane.b32.xlu1 %v2414_v61, %s2101_s21  ;;  %s1842_s21 = sshll.u32 %s2110_s18, 4  ;;  %s1843_s21 = int_to_ptr.vmem [resolvable:$true] %s1842_s21 }
 0x7da   :  { %v1224_v54 = vpop.xlane.xlu0 %1223 }
 0x7db   :  { %2024 = vrcp.f32 %v1224_v54  ;;  %v1239_v58 = vand.u32 2147483648, %v1224_v54  ;;  %v1237_v4 = vand.u32 2147483647, %v1224_v54  ;;  %vm1233_vm7 = vweird.f32 %v1224_v54 }
 0x7dd   :  { %v1240_v52 = vor.u32 1.1754944e-38, %v1239_v58  ;;  %vm1238_vm10 = vcmp.eq.f32.partialorder %v1237_v4, 8.507059e+37 }
 0x7e1   :  { %v2025_v62 = vpop.eup %2024 }
 0x7e2   :  { %v1229_v12 = vmul.f32 %v2025_v62, %v1224_v54  ;;  %v1384_v2 = vpop.xlane.xlu1 %1383  ;;  %vm1234_vm6 = vweird.f32 %v2025_v62 }
 0x7e3   :  { %2026 = vrcp.f32 %v1384_v2  ;;  %vm1235_vm9 = vmor %vm1233_vm7, %vm1234_vm6  ;;  %v1397_v17 = vand.u32 2147483647, %v1384_v2  ;;  %v1399_v20 = vand.u32 2147483648, %v1384_v2  ;;  %vm1393_vm12 = vweird.f32 %v1384_v2 }
 0x7e4   :  { %v1230_v3 = vsub.f32 1.0, %v1229_v12 }
 0x7e5   :  { %vm1398_vm14 = vcmp.eq.f32.partialorder %v1397_v17, 8.507059e+37 }
 0x7e6   :  { %v1231_v0 = vmul.f32 %v2025_v62, %v1230_v3 }
 0x7e7   :  { %v1227_v5 = vpop.xlane.xlu2 %1226 }
 0x7e8   :  { %v1232_v7 = vadd.f32 %v2025_v62, %v1231_v0  ;;  %2028 = vrcp.f32 %v1227_v5  ;;  %v1253_v25 = vand.u32 2147483648, %v1227_v5  ;;  %v1251_v8 = vand.u32 2147483647, %v1227_v5 }
 0x7e9   :  { %v2027_v9 = vpop.eup %2026  ;;  %vm1247_vm3 = vweird.f32 %v1227_v5 }
 0x7ea   :  { %v1236_v10 = vsel %vm1235_vm9, %v2025_v62, %v1232_v7  ;;  %v1389_v11 = vmul.f32 %v2027_v9, %v1384_v2  ;;  %vm1394_vm11 = vweird.f32 %v2027_v9  ;;  %v1254_v33 = vor.u32 1.1754944e-38, %v1253_v25 }
 0x7eb   :  { %v1241_v61 = vsel %vm1238_vm10, %v1240_v52, %v1236_v10  ;;  %vm1395_vm13 = vmor %vm1393_vm12, %vm1394_vm11  ;;  %vm1252_vm5 = vcmp.eq.f32.partialorder %v1251_v8, 8.507059e+37 }
 0x7ec   :  { %v1256_v13 = vmul.f32 %v2494_v6, %v1241_v61  ;;  %v1390_v14 = vsub.f32 1.0, %v1389_v11  ;;  %v1400_v6 = vor.u32 1.1754944e-38, %v1399_v20 }
 0x7ed   :  { %v1285_v63 = vpop.permute.xlu0 %1284 }
 0x7ee   :  { %v2029_v15 = vpop.eup %2028  ;;  %1899 = vmatmul.msk.f32.vlgmr.msrb.gmra.mxu2 %vm161_vm8, %v1256_v13  ;;  %1305 = vmatpush.msra.mxu0 %v1285_v63  ;;  %v1391_v23 = vmul.f32 %v2027_v9, %v1390_v14 }
 0x7ef   :  { %v1243_v21 = vmul.f32 %v2029_v15, %v1227_v5  ;;  %v1387_v22 = vpop.xlane.xlu1 %1386  ;;  %v1445_v24 = vpop.permute.xlu2 %1444  ;;  %vm1248_vm2 = vweird.f32 %v2029_v15 }
 0x7f0   :  { %2030 = vrcp.f32 %v1387_v22  ;;  %1465 = vmatpush.msrb.mxu0 %v1445_v24  ;;  %v1392_v59 = vadd.f32 %v2027_v9, %v1391_v23  ;;  %vm1249_vm4 = vmor %vm1247_vm3, %vm1248_vm2  ;;  %v1413_v42 = vand.u32 2147483648, %v1387_v22  ;;  %v1411_v43 = vand.u32 2147483647, %v1387_v22  ;;  %v1662_v24 = vld [vmem:[#allocation2 + $0x80] sm:$0xff] }
 0x7f1   :  { %v1244_v34 = vsub.f32 1.0, %v1243_v21  ;;  %vm1407_vm7 = vweird.f32 %v1387_v22 }
 0x7f2   :  { %v1396_v26 = vsel %vm1395_vm13, %v2027_v9, %v1392_v59  ;;  %v1414_v46 = vor.u32 1.1754944e-38, %v1413_v42  ;;  %vm1412_vm10 = vcmp.eq.f32.partialorder %v1411_v43, 8.507059e+37  ;;  %v1661_v59 = vld [vmem:[#allocation2 + $0x50] sm:$0xff] }
 0x7f3   :  { %v1245_v29 = vmul.f32 %v2029_v15, %v1244_v34  ;;  %v1401_v16 = vsel %vm1398_vm14, %v1400_v6, %v1396_v26  ;;  %v1660_v34 = vld [vmem:[#allocation2 + $0x20] sm:$0xff] }
 0x7f4   :  { %v1416_v31 = vmul.f32 %v2498_v18, %v1401_v16 }
 0x7f5   :  { %v1246_v30 = vadd.f32 %v2029_v15, %v1245_v29  ;;  %v1605_v44 = vpop.permute.xlu0 %1604 }
 0x7f6   :  { %v2031_v27 = vpop.eup %2030  ;;  %1905 = vmatmul.msk.f32.vlgmr.msra.gmra.mxu2 %vm161_vm8, %v1416_v31 }
 0x7f7   :  { %v1250_v32 = vsel %vm1249_vm4, %v2029_v15, %v1246_v30  ;;  %v1403_v36 = vmul.f32 %v2031_v27, %v1387_v22  ;;  %v1544_v37 = vpop.xlane.xlu1 %1543  ;;  %vm1408_vm6 = vweird.f32 %v2031_v27  ;;  %v1663_v22 = vld [vmem:[#allocation2 + $0xb0] sm:$0xff] }
 0x7f8   :  { %v1255_v39 = vsel %vm1252_vm5, %v1254_v33, %v1250_v32  ;;  %2032 = vrcp.f32 %v1544_v37  ;;  %vm1409_vm9 = vmor %vm1407_vm7, %vm1408_vm6  ;;  %v1559_v4 = vand.u32 2147483648, %v1544_v37  ;;  %vm1553_vm2 = vweird.f32 %v1544_v37  ;;  %1682 = vmatpush.msrb.mxu3 %v1663_v22 }
 0x7f9   :  { %v1404_v40 = vsub.f32 1.0, %v1403_v36  ;;  %v1257_v41 = vmul.f32 %v2502_v28, %v1255_v39  ;;  %v1121_v63 = vpop.f32.mrf.mxu2 }
 0x7fa   :  { %v1560_v61 = vor.u32 1.1754944e-38, %v1559_v4  ;;  %1683 = vmatpush.msrb.mxu3 %v1662_v24  ;;  %v1959_v24 = vld [vmem:[%s2635_s6 + $0x5] ss:$0 sm:$0xff] }
 0x7fb   :  { %v1405_v35 = vmul.f32 %v2031_v27, %v1404_v40  ;;  %1900 = vmatmul.msk.f32.vlgmr.msra.gmra.mxu0 %vm161_vm8, %v1257_v41 }
 0x7fc   :  { %1625 = vmatpush.msra.mxu0 %v1605_v44  ;;  %1684 = vmatpush.msrb.mxu3 %v1661_v59 }
 0x7fd   :  { %v1406_v18 = vadd.f32 %v2031_v27, %v1405_v35 }
 0x7fe   :  { %v2033_v45 = vpop.eup %2032  ;;  %1685 = vmatpush.msrb.mxu3 %v1660_v34 }
 0x7ff   :  { %v1410_v48 = vsel %vm1409_vm9, %v2031_v27, %v1406_v18  ;;  %v1547_v49 = vpop.xlane.xlu1 %1546  ;;  %v1549_v53 = vmul.f32 %v2033_v45, %v1544_v37  ;;  %vm1554_vm12 = vweird.f32 %v2033_v45 }
 0x800   :  { %v1415_v50 = vsel %vm1412_vm10, %v1414_v46, %v1410_v48  ;;  %2034 = vrcp.f32 %v1547_v49  ;;  %v1573_v12 = vand.u32 2147483648, %v1547_v49  ;;  %v1571_v3 = vand.u32 2147483647, %v1547_v49  ;;  %vm1555_vm4 = vmor %vm1553_vm2, %vm1554_vm12 }
 0x801   :  { %v1417_v28 = vmul.f32 %v2509_v38, %v1415_v50  ;;  %v1550_v55 = vsub.f32 1.0, %v1549_v53  ;;  %vm1567_vm13 = vweird.f32 %v1547_v49  ;;  %v1557_v38 = vand.u32 2147483647, %v1544_v37  ;;  %v1147_v15 = vpop.f32.mrf.mxu0  ;;  %v1957_v37 = vld [vmem:[%s2635_s6 + $0xa] ss:$0 sm:$0xff]  ;;  %v1756_v53 = vld [vmem:[#allocation2 + $0x58] sm:$0xff] }
 0x802   :  { %v1574_v5 = vor.u32 1.1754944e-38, %v1573_v12  ;;  %vm1572_vm3 = vcmp.eq.f32.partialorder %v1571_v3, 8.507059e+37  ;;  %v1757_v50 = vld [vmem:[#allocation2 + $0x88] sm:$0xff]  ;;  %vm1800_vm10 = vcmask 523264  }
 0x803   :  { %1906 = vmatmul.msk.f32.vlgmr.msrb.gmra.mxu0 %vm161_vm8, %v1417_v28  ;;  %v1551_v54 = vmul.f32 %v2033_v45, %v1550_v55  ;;  %vm1558_vm5 = vcmp.eq.f32.partialorder %v1557_v38, 8.507059e+37 }
 0x805   :  { %v1552_v58 = vadd.f32 %v2033_v45, %v1551_v54 }
 0x806   :  { %v2035_v56 = vpop.eup %2034 }
 0x807   :  { %v1563_v60 = vmul.f32 %v2035_v56, %v1547_v49  ;;  %vm1568_vm11 = vweird.f32 %v2035_v56  ;;  %v1556_v9 = vsel %vm1555_vm4, %v2033_v45, %v1552_v58  ;;  %v1758_v49 = vld [vmem:[#allocation2 + $0xb8] sm:$0xff] }
 0x808   :  { %vm1569_vm14 = vmor %vm1567_vm13, %vm1568_vm11  ;;  %v1561_v11 = vsel %vm1558_vm5, %v1560_v61, %v1556_v9  ;;  %1779 = vmatpush.msra.mxu1 %v1758_v49  ;;  %v1799_v58 = vld [vmem:[%s2634_s5 + $0x38] sm:$0xff]  ;;  %v1796_v9 = vld [vmem:[%s2634_s5 + $0x20] sm:$0xff] }
 0x809   :  { %v1564_v62 = vsub.f32 1.0, %v1563_v60  ;;  %v1576_v14 = vmul.f32 %v2516_v47, %v1561_v11  ;;  %v1795_v11 = vld [vmem:[%s2634_s5 + $0x18] sm:$0xff] }
 0x80a   :  { %1780 = vmatpush.msra.mxu1 %v1757_v50 }
 0x80b   :  { %v1565_v2 = vmul.f32 %v2035_v56, %v1564_v62 }
 0x80c   :  { %1781 = vmatpush.msra.mxu1 %v1756_v53 }
 0x80d   :  { %v1566_v0 = vadd.f32 %v2035_v56, %v1565_v2 }
 0x80f   :  { %v1570_v7 = vsel %vm1569_vm14, %v2035_v56, %v1566_v0  ;;  %v1798_v0 = vld [vmem:[%s2634_s5 + $0x30] sm:$0xff] }
 0x810   :  { %v1575_v52 = vsel %vm1572_vm3, %v1574_v5, %v1570_v7  ;;  %v1797_v7 = vld [vmem:[%s2634_s5 + $0x28] sm:$0xff] }
 0x811   :  { %v1577_v10 = vmul.f32 %v2524_v1, %v1575_v52 }
 0x813   :  { %1912 = vmatmul.msk.f32.vlgmr.msra.gmra.mxu0 %vm161_vm8, %v1577_v10 }
 0x817   :  { %v1579_v13 = vpop.permute.xlu1 %1578 }
 0x818   :  { %1599 = vmatpush.msrb.mxu2 %v1579_v13 }
 0x819   :  { %1911 = vmatmul.msk.f32.vlgmr.msrb.gmra.mxu2 %vm161_vm8, %v1576_v14 }
 0x81a   :  { %1815 = vmatpush.msra.mxu2 %v1799_v58 }
 0x81c   :  { %1816 = vmatpush.msra.mxu2 %v1798_v0 }
 0x81e   :  { %1817 = vmatpush.msra.mxu2 %v1797_v7 }
 0x820   :  { %1818 = vmatpush.msra.mxu2 %v1796_v9 }
 0x822   :  { %1819 = vmatpush.msra.mxu2 %v1795_v11 }
 0x871   :  { %v1281_v17 = vpop.f32.mrf.mxu2 }
 0x872   :  { %1632 = vrot.lane.b32.xlu2 %v1281_v17, %s2107_s29 }
 0x878   :  { %v1307_v20 = vpop.f32.mrf.mxu0 }
 0x879   :  { %v1441_v23 = vpop.f32.mrf.mxu2 }
 0x87a   :  { %1640 = vrot.lane.b32.xlu0 %v1441_v23, %s2108_s30 }
 0x880   :  { %v1467_v1 = vpop.f32.mrf.mxu0 }
 0x881   :  { %1642 = vrot.lane.b32.xlu1 %v1467_v1, %s2108_s30  ;;  %v1958_v1 = vld [vmem:[%s2635_s6 + $0x4] ss:$0 sm:$0xff] }
 0x882   :  { %1634 = vrot.lane.b32.xlu0 %v1307_v20, %s2107_s29 }
 0x890   :  { %v1627_v47 = vpop.f32.mrf.mxu0 }
 0x89c   :  { %v1601_v21 = vpop.f32.mrf.mxu2 }
 0x89d   :  { %1648 = vrot.lane.b32.xlu2 %v1601_v21, %s2109_s8 }
 0x8a5   :  { %1650 = vrot.lane.b32.xlu2 %v1627_v47, %s2109_s8 }
 0x8cc   :  { %v1633_v6 = vpop.permute.xlu2 %1632 }
 0x8cd   :  { %v1654_v26 = vsel %vm161_vm8, %v1121_v63, %v1633_v6 }
 0x8ec   :  { %v1641_v25 = vpop.permute.xlu0 %1640 }
 0x8ed   :  { %v1656_v29 = vsel %vm823_vm15, %v1654_v26, %v1641_v25 }
 0x8f3   :  { %v1643_v27 = vpop.permute.xlu1 %1642 }
 0x8f4   :  { %v1635_v30 = vpop.permute.xlu0 %1634 }
 0x8f5   :  { %v1655_v31 = vsel %vm161_vm8, %v1147_v15, %v1635_v30 }
 0x8f6   :  { %v1657_v32 = vsel %vm823_vm15, %v1655_v31, %v1643_v27  ;;  %v1794_v27 = vld [vmem:[%s2634_s5 + $0x10] sm:$0xff] }
 0x8f7   :  { %v1649_v8 = vpop.permute.xlu2 %1648  ;;  %1820 = vmatpush.msra.mxu2 %v1794_v27 }
 0x8f8   :  { %v1658_v16 = vsel %vm826_vm1, %v1656_v29, %v1649_v8 }
 0x8f9   :  { %1913 = vmatmul.msk.f32.vlgmr.msrb.gmra.mxu3 %vm61_vm0, %v1658_v16 }
 0x8ff   :  { %v1651_v33 = vpop.permute.xlu2 %1650 }
 0x900   :  { %v1659_v36 = vsel %vm826_vm1, %v1657_v32, %v1651_v33  ;;  %v1793_v33 = vld [vmem:[%s2634_s5 + $0x8] sm:$0xff]  ;;  %v1792_v32 = vld [vmem:[%s2634_s5] sm:$0xff] }
 0x901   :  { %1914 = vmatmul.msk.f32.gmra.mxu3 %vm61_vm0, %v1659_v36  ;;  %1821 = vmatpush.msra.mxu2 %v1793_v33  ;;  %v1960_v36 = vld [vmem:[%s2635_s6 + $0xb] ss:$0 sm:$0xff] }
 0x903   :  { %1822 = vmatpush.msra.mxu2 %v1792_v32 }
 0x97c   :  { %v1687_v39 = vpop.f32.mrf.mxu3 }
 0x97d   :  { %v1693_v40 = vadd.f32 %v1687_v39, %v2374_v51 }
 0x97f   :  { %v2562_v41 = vadd.f32 %v1957_v37, %v1693_v40 }
 0x981   :  { %v1701_v42 = vsel %vm61_vm0, %v2562_v41, 0.0  ;;  %v1709_v35 = vmul.f32 %v2562_v41, %v2562_v41 }
 0x982   :  { %1702 = vadd.xlane.f32.xlu0 %v1701_v42 }
 0x983   :  { %v1711_v43 = vsel %vm61_vm0, %v1709_v35, 0.0 }
 0x984   :  { %1712 = vadd.xlane.f32.xlu1 %v1711_v43  ;;  %v1690_v44 = vpop.f32.mrf.mxu3 }
 0x985   :  { %v1694_v18 = vadd.f32 %v1690_v44, %v2382_v57  ;;  %v1755_v57 = vld [vmem:[#allocation2 + $0x28] sm:$0xff] }
 0x986   :  { %1782 = vmatpush.msra.mxu1 %v1755_v57  ;;  %v1961_v44 = vld [vmem:[%s2635_s6 + $0xc] ss:$0 sm:$0xff]  ;;  %s2111_s6 = smov 128  }
 0x987   :  { %v2570_v45 = vadd.f32 %v1957_v37, %v1694_v18 }
 0x989   :  { %v1704_v51 = vsel %vm61_vm0, %v2570_v45, 0.0  ;;  %v1710_v46 = vmul.f32 %v2570_v45, %v2570_v45 }
 0x98a   :  { %1705 = vadd.xlane.f32.xlu2 %v1704_v51 }
 0x98b   :  { %v1714_v48 = vsel %vm61_vm0, %v1710_v46, 0.0 }
 0x98c   :  { %1715 = vadd.xlane.f32.xlu0 %v1714_v48 }
 0x9f5   :  { %v1703_v28 = vpop.xlane.xlu0 %1702 }
 0x9f6   :  { %v1707_v55 = vmul.f32 %v1703_v28, %v2176_v19 }
 0x9f7   :  { %v1713_v56 = vpop.xlane.xlu1 %1712 }
 0x9f8   :  { %v1719_v60 = vmul.f32 %v1707_v55, %v1707_v55  ;;  %v1717_v54 = vmul.f32 %v1713_v56, %v2176_v19  ;;  %v1723_v23 = vsub.f32 %v2562_v41, %v1707_v55 }
 0x9fa   :  { %v1721_v62 = vsub.f32 %v1717_v54, %v1719_v60 }
 0x9fc   :  { %v1725_v12 = vadd.f32 1e-05, %v1721_v62 }
 0x9fd   :  { %v1706_v2 = vpop.xlane.xlu2 %1705 }
 0x9fe   :  { %2036 = vrsqrt.f32 %v1725_v12  ;;  %v1708_v3 = vmul.f32 %v1706_v2, %v2176_v19  ;;  %vm1733_vm15 = vweird.f32 %v1725_v12 }
 0x9ff   :  { %v1716_v4 = vpop.xlane.xlu0 %1715 }
 0xa00   :  { %v1720_v5 = vmul.f32 %v1708_v3, %v1708_v3  ;;  %v1718_v38 = vmul.f32 %v1716_v4, %v2176_v19  ;;  %v1724_v29 = vsub.f32 %v2570_v45, %v1708_v3 }
 0xa02   :  { %v1722_v52 = vsub.f32 %v1718_v38, %v1720_v5 }
 0xa04   :  { %v2037_v10 = vpop.eup %2036  ;;  %v1726_v61 = vadd.f32 1e-05, %v1722_v52 }
 0xa05   :  { %v1728_v13 = vmul.f32 %v2037_v10, %v1725_v12  ;;  %vm1734_vm8 = vweird.f32 %v2037_v10 }
 0xa06   :  { %2038 = vrsqrt.f32 %v1726_v61  ;;  %vm1735_vm1 = vmor %vm1733_vm15, %vm1734_vm8  ;;  %vm1743_vm7 = vweird.f32 %v1726_v61 }
 0xa07   :  { %v1729_v19 = vmul.f32 %v2037_v10, %v1728_v13 }
 0xa09   :  { %v1730_v14 = vmul.f32 0.5, %v1729_v19 }
 0xa0b   :  { %v1731_v63 = vsub.f32 1.5, %v1730_v14 }
 0xa0c   :  { %v2039_v15 = vpop.eup %2038 }
 0xa0d   :  { %v1732_v17 = vmul.f32 %v2037_v10, %v1731_v63  ;;  %v1738_v20 = vmul.f32 %v2039_v15, %v1726_v61  ;;  %vm1744_vm6 = vweird.f32 %v2039_v15 }
 0xa0e   :  { %vm1745_vm9 = vmor %vm1743_vm7, %vm1744_vm6 }
 0xa0f   :  { %v1736_v21 = vsel %vm1735_vm1, %v2037_v10, %v1732_v17  ;;  %v1739_v47 = vmul.f32 %v2039_v15, %v1738_v20 }
 0xa10   :  { %v1747_v22 = vmul.f32 %v1736_v21, %v1723_v23 }
 0xa11   :  { %v1740_v59 = vmul.f32 0.5, %v1739_v47 }
 0xa12   :  { %v1750_v34 = vmul.f32 %v1958_v1, %v1747_v22 }
 0xa13   :  { %v1741_v6 = vsub.f32 1.5, %v1740_v59 }
 0xa14   :  { %v1753_v25 = vadd.f32 %v1959_v24, %v1750_v34 }
 0xa15   :  { %v1742_v26 = vmul.f32 %v2039_v15, %v1741_v6 }
 0xa16   :  { %1915 = vmatmul.msk.f32.vlgmr.msra.gmra.mxu1 %vm61_vm0, %v1753_v25 }
 0xa17   :  { %v1746_v8 = vsel %vm1745_vm9, %v2039_v15, %v1742_v26 }
 0xa18   :  { %v1748_v16 = vmul.f32 %v1746_v8, %v1724_v29 }
 0xa1a   :  { %v1751_v30 = vmul.f32 %v1958_v1, %v1748_v16 }
 0xa1c   :  { %v1754_v31 = vadd.f32 %v1959_v24, %v1751_v30 }
 0xa1e   :  { %1916 = vmatmul.msk.f32.gmra.mxu1 %vm61_vm0, %v1754_v31 }
 0xa93   :  { %v1784_v37 = vpop.f32.mrf.mxu1 }
 0xa94   :  { %v1785_v39 = vadd.f32 %v1960_v36, %v1784_v37 }
 0xa96   :  { %v1790_v40 = vmax.f32 %v1785_v39, 0.0 }
 0xa98   :  { %1917 = vmatmul.msk.f32.vlgmr.msra.gmra.mxu2 %vm1800_vm10, %v1790_v40 }
 0xa9b   :  { %v1787_v42 = vpop.f32.mrf.mxu1 }
 0xa9c   :  { %v1788_v35 = vadd.f32 %v1960_v36, %v1787_v42 }
 0xa9e   :  { %v1791_v43 = vmax.f32 %v1788_v35, 0.0 }
 0xaa0   :  { %1918 = vmatmul.msk.f32.gmra.mxu2 %vm1800_vm10, %v1791_v43 }
 0xb1b   :  { %v1824_v18 = vpop.f32.mrf.mxu2 }
 0xb1c   :  { %v1830_v51 = vadd.f32 %v1824_v18, %v2562_v41 }
 0xb1e   :  { %v1834_v46 = vadd.f32 %v1961_v44, %v1830_v51 }
 0xb20   :  { %1836 = vst.msk [vmem:[#allocation5] sm:$0xff] %vm61_vm0, %v1834_v46 }
 0xb23   :  { %v1827_v48 = vpop.f32.mrf.mxu2 }
 0xb24   :  { %v1831_v49 = vadd.f32 %v1827_v48, %v2570_v45 }
 0xb26   :  { %v1835_v50 = vadd.f32 %v1961_v44, %v1831_v49 }
 0xb28   :  { %1837 = vst.msk [vmem:[#allocation5 + $0x8] sm:$0xff] %vm61_vm0, %v1835_v50 }
 0xb29   :  { %1850 = dma.vmem_to_hbm [thread:$0]  %s1843_s21, 256, %s1845_s3, [#allocation4], %s2111_s6, %s2111_s6, %s2107_s29  }
 0xb2a   :  { %2090 = dma.done.wait [#allocation4], 256  }
 0xb2b   :  { %2091 = vsyncadd [#allocation4], 4294967040 }
 0xb2c   :  { %1855 = vsyncpa [#allocation3], 1 }
 0xb2d   :  { %1856 = vsyncpa [#allocation4], 1 }

</bundles_post_ra>
